<compile_context>
chip_gen: v7x
topology: tpu7x:2x2x1
jax: 0.10.0
libtpu: 0.0.40
codegen_flags: <defaults>
</compile_context>

<pallas_src>
import functools

import jax
import jax.numpy as jnp
import numpy as np
from jax.experimental import pallas as pl
from jax.experimental.pallas import tpu as pltpu


# ----------------------------------------------------------------------------
# Kernel 1: fused 3x3 / stride-2 / pad-1 conv  (+bias, +optional ReLU).
# ----------------------------------------------------------------------------
def _conv3x3_s2_kernel(x_ref, wa_ref, wb_ref, b_ref, o_ref, *, ho, wo_pad, cin, relu):
    # x_ref : (Hh, 2, W2p, 2*cin)  -- padded input, H/W stride phases folded in
    # wa_ref: (3, 2*cin, Cout)     -- taps (i,0),(i,1) stacked along channels
    # wb_ref: (3,   cin, Cout)     -- tap  (i,2)
    # b_ref : (1, Cout) f32        -- bias
    # o_ref : (ho, wo_pad, Cout)
    cout = o_ref.shape[-1]
    c2 = 2 * cin
    m = ho * wo_pad
    acc = jnp.zeros((m, cout), jnp.float32)
    for i in range(3):                       # kernel rows, static unroll
        base, ph = i // 2, i % 2
        # taps (i, 0) and (i, 1): folded column ow, both sub-channel halves.
        a = x_ref[base:base + ho, ph, 0:wo_pad, :]            # (ho, wo_pad, 2*cin)
        acc += jnp.dot(a.reshape(m, c2), wa_ref[i],
                       preferred_element_type=jnp.float32)
        # tap (i, 2): folded column ow + 1, first sub-channel half.
        t2 = x_ref[base:base + ho, ph, 1:1 + wo_pad, 0:cin]   # (ho, wo_pad, cin)
        acc += jnp.dot(t2.reshape(m, cin), wb_ref[i],
                       preferred_element_type=jnp.float32)
    acc = acc + b_ref[...]                   # bias add in f32
    if relu:
        acc = jnp.maximum(acc, 0.0)
    o_ref[...] = acc.reshape(ho, wo_pad, cout).astype(o_ref.dtype)


def conv3x3_s2_pallas(x, w, b, *, relu):
    """3x3 conv, stride 2, padding 1.  x: (N,H,W,Cin) NHWC; w: (3,3,Cin,Cout) f32."""
    n, h, wdt, cin = x.shape
    assert h % 2 == 0 and wdt % 2 == 0, "even spatial dims expected"
    cout = w.shape[-1]
    ho, wo = h // 2, wdt // 2
    # Round the working output width up to a sublane multiple (8 rows for f32,
    # 16 for bf16) so all in-kernel reshapes are layout-trivial.
    sub = 8 * 4 // jnp.dtype(x.dtype).itemsize
    wo_pad = max(sub, ((wo + sub - 1) // sub) * sub)
    hh = ho + 1                  # folded (row-pair) height of the padded input
    w2p = wo_pad + 1             # folded (col-pair) width of the padded input
    pad_r = 2 * w2p - 1 - wdt    # conv pad (1 left) + extra zeros up to 2*w2p
    xp = jnp.pad(x, ((0, 0), (1, 1), (1, pad_r), (0, 0)))
    # Free views: fold stride-2 phases of H and W into minor dims so the kernel
    # only needs contiguous static slices (fused im2col, no 9x HBM blowup).
    x5 = xp.reshape(n, hh, 2, w2p, 2 * cin)
    wa = w[:, 0:2].reshape(3, 2 * cin, cout).astype(x.dtype)   # taps (i,0),(i,1)
    wb = w[:, 2].reshape(3, cin, cout).astype(x.dtype)         # tap  (i,2)
    bias = b.reshape(1, cout).astype(jnp.float32)

    out = pl.pallas_call(
        functools.partial(_conv3x3_s2_kernel, ho=ho, wo_pad=wo_pad, cin=cin,
                          relu=relu),
        out_shape=jax.ShapeDtypeStruct((n, ho, wo_pad, cout), x.dtype),
        grid=(n,),
        in_specs=[
            pl.BlockSpec((None, hh, 2, w2p, 2 * cin), lambda i: (i, 0, 0, 0, 0)),
            pl.BlockSpec((3, 2 * cin, cout), lambda i: (0, 0, 0)),
            pl.BlockSpec((3, cin, cout), lambda i: (0, 0, 0)),
            pl.BlockSpec((1, cout), lambda i: (0, 0)),
        ],
        out_specs=pl.BlockSpec((None, ho, wo_pad, cout), lambda i: (i, 0, 0, 0)),
        compiler_params=pltpu.CompilerParams(dimension_semantics=("parallel",)),
    )(x5, wa, wb, bias)
    return out if wo_pad == wo else out[:, :, :wo, :]


# ----------------------------------------------------------------------------
# Kernel 2: fused 1x1 classifier + x8 bilinear upsample, emits NCHW directly.
# ----------------------------------------------------------------------------
def _cls_upsample_kernel(x_ref, wc_ref, uh_ref, uw_ref, o_ref, *, nclass):
    # x_ref : (h, w, Cf+1)   features with a trailing ones channel
    # wc_ref: (nclass, Cf+1) classifier weights with bias folded into last col
    # uh_ref: (Hout, h)      row-interpolation matrix
    # uw_ref: (w, Wout)      column-interpolation matrix (transposed)
    # o_ref : (nclass, Hout, Wout)
    feat = x_ref[...].astype(jnp.float32)
    uh = uh_ref[...]
    uw = uw_ref[...]
    for c in range(nclass):                              # static unroll
        wrow = wc_ref[c].astype(jnp.float32)             # (Cf+1,)
        g = jnp.sum(feat * wrow, axis=-1)                # (h, w): 1x1 conv + bias
        t = jnp.dot(uh, g, preferred_element_type=jnp.float32)        # (Hout, w)
        o_ref[c] = jnp.dot(t, uw, preferred_element_type=jnp.float32)  # (Hout, Wout)


def bilinear_matrix(out_size, in_size):
    """Interp matrix matching torch F.interpolate(bilinear, align_corners=False)."""
    scale = in_size / out_size
    dst = np.arange(out_size, dtype=np.float64)
    src = np.clip((dst + 0.5) * scale - 0.5, 0.0, in_size - 1)
    i0 = np.floor(src).astype(np.int64)
    i1 = np.minimum(i0 + 1, in_size - 1)
    w1 = src - i0
    w0 = 1.0 - w1
    m = np.zeros((out_size, in_size), dtype=np.float32)
    m[np.arange(out_size), i0] += w0.astype(np.float32)
    m[np.arange(out_size), i1] += w1.astype(np.float32)
    return jnp.asarray(m)


def classifier_upsample_pallas(feat, wc, bc, *, factor):
    """feat: (N,h,w,Cf) NHWC; wc: (Cf, nclass); bc: (nclass,).  Returns NCHW."""
    n, h, w, cf = feat.shape
    nclass = wc.shape[-1]
    hout, wout = h * factor, w * factor
    # Fold the classifier bias into the channel contraction via a ones channel.
    feat_aug = jnp.concatenate([feat, jnp.ones((n, h, w, 1), feat.dtype)], axis=-1)
    wc_aug = jnp.concatenate([wc.T, bc[:, None]], axis=1).astype(jnp.float32)
    uh = bilinear_matrix(hout, h)          # (Hout, h)
    uwt = bilinear_matrix(wout, w).T       # (w, Wout)

    return pl.pallas_call(
        functools.partial(_cls_upsample_kernel, nclass=nclass),
        out_shape=jax.ShapeDtypeStruct((n, nclass, hout, wout), jnp.float32),
        grid=(n,),
        in_specs=[
            pl.BlockSpec((None, h, w, cf + 1), lambda i: (i, 0, 0, 0)),
            pl.BlockSpec((nclass, cf + 1), lambda i: (0, 0)),
            pl.BlockSpec((hout, h), lambda i: (0, 0)),
            pl.BlockSpec((w, wout), lambda i: (0, 0)),
        ],
        out_specs=pl.BlockSpec((None, nclass, hout, wout), lambda i: (i, 0, 0, 0)),
        compiler_params=pltpu.CompilerParams(dimension_semantics=("parallel",)),
    )(feat_aug, wc_aug, uh, uwt)


# ----------------------------------------------------------------------------
# DeepLabV1 forward.
# ----------------------------------------------------------------------------
def init_params(key, c_in=4, num_classes=5):
    ks = jax.random.split(key, 8)

    def wgen(k, shape):
        fan_in = shape[0] * shape[1] * shape[2]
        return jax.random.normal(k, shape, jnp.float32) * (1.0 / np.sqrt(fan_in))

    return {
        "w1": wgen(ks[0], (3, 3, c_in, 8)), "b1": jax.random.normal(ks[1], (8,)) * 0.01,
        "w2": wgen(ks[2], (3, 3, 8, 16)),   "b2": jax.random.normal(ks[3], (16,)) * 0.01,
        "w3": wgen(ks[4], (3, 3, 16, 16)),  "b3": jax.random.normal(ks[5], (16,)) * 0.01,
        "wc": wgen(ks[6], (1, 1, 16, num_classes)),
        "bc": jax.random.normal(ks[7], (num_classes,)) * 0.01,
    }


def deeplab_v1_forward(params, x_nchw, upsampling=8, compute_dtype=jnp.float32):
    # NCHW -> NHWC for the conv kernels; the final kernel emits NCHW directly.
    x = jnp.transpose(x_nchw, (0, 2, 3, 1)).astype(compute_dtype)
    h = conv3x3_s2_pallas(x, params["w1"], params["b1"], relu=True)
    h = conv3x3_s2_pallas(h, params["w2"], params["b2"], relu=True)
    h = conv3x3_s2_pallas(h, params["w3"], params["b3"], relu=True)
    wc = params["wc"].reshape(params["wc"].shape[-2], params["wc"].shape[-1])
    return classifier_upsample_pallas(h, wc, params["bc"], factor=upsampling)


# ----------------------------------------------------------------------------
# Pure-JAX reference (same math, no Pallas) for a correctness check.
# ----------------------------------------------------------------------------
def im2col(x, kh, kw, stride, pad):
    x = jnp.pad(x, ((0, 0), (pad, pad), (pad, pad), (0, 0)))
    N, H, W, C = x.shape
    Ho = (H - kh) // stride + 1
    Wo = (W - kw) // stride + 1
    patches = []
    for i in range(kh):
        for j in range(kw):
            patches.append(
                x[:, i:i + stride * Ho:stride, j:j + stride * Wo:stride, :])
    p = jnp.stack(patches, axis=3)
    return p.reshape(N, Ho, Wo, kh * kw * C), Ho, Wo


def _ref_conv(x, w, b, stride, pad, relu):
    cols, Ho, Wo = im2col(x, w.shape[0], w.shape[1], stride, pad)
    N = x.shape[0]
    out = cols.reshape(N * Ho * Wo, -1) @ w.reshape(-1, w.shape[-1]) + b
    if relu:
        out = jnp.maximum(out, 0.0)
    return out.reshape(N, Ho, Wo, w.shape[-1])


def deeplab_v1_reference(params, x_nchw, upsampling=8):
    x = jnp.transpose(x_nchw, (0, 2, 3, 1)).astype(jnp.float32)
    h = _ref_conv(x, params["w1"], params["b1"], 2, 1, True)
    h = _ref_conv(h, params["w2"], params["b2"], 2, 1, True)
    h = _ref_conv(h, params["w3"], params["b3"], 2, 1, True)
    h = _ref_conv(h, params["wc"], params["bc"], 1, 0, False)
    _, hh, ww, _ = h.shape
    uh = bilinear_matrix(hh * upsampling, hh)
    uw = bilinear_matrix(ww * upsampling, ww)
    y = jnp.einsum("Hh,nhwc->nHwc", uh, h)
    y = jnp.einsum("Ww,nhwc->nhWc", uw, y)
    return jnp.transpose(y, (0, 3, 1, 2))


if __name__ == "__main__":
    key = jax.random.PRNGKey(0)
    k_x, k_p = jax.random.split(key)
    N, C_in, H, W = 2, 4, 16, 16
    num_classes = 5

    x = jax.random.normal(k_x, (N, C_in, H, W), dtype=jnp.float32)   # NCHW input
    params = init_params(k_p, c_in=C_in, num_classes=num_classes)

    fwd = jax.jit(deeplab_v1_forward, static_argnames=("upsampling", "compute_dtype"))

    # f32 path: exact check against the pure-JAX reference.
    out = jax.block_until_ready(fwd(params, x, upsampling=8))
    assert out.shape == (N, num_classes, H, W), out.shape
    ref = jax.block_until_ready(deeplab_v1_reference(params, x, upsampling=8))
    np.testing.assert_allclose(np.asarray(out), np.asarray(ref), rtol=1e-4, atol=1e-4)

    # bf16 path (halved HBM traffic, f32 accumulation): smoke test.
    out_bf16 = jax.block_until_ready(
        fwd(params, x, upsampling=8, compute_dtype=jnp.bfloat16))
    assert out_bf16.shape == (N, num_classes, H, W), out_bf16.shape
    assert bool(jnp.isfinite(out_bf16).all())

    print("KERNEL_OK")
</pallas_src>

<mosaic_0001>
module attributes {stable_mosaic.version = 11 : i64} {
  func.func @_conv3x3_s2_kernel(%arg0: i32, %arg1: memref<1x9x2x9x8xf32, #tpu.memory_space<vmem>>, %arg2: memref<3x8x8xf32, #tpu.memory_space<vmem>>, %arg3: memref<3x4x8xf32, #tpu.memory_space<vmem>>, %arg4: memref<1x8xf32, #tpu.memory_space<vmem>>, %arg5: memref<1x8x8x8xf32, #tpu.memory_space<vmem>>) attributes {dimension_semantics = [#tpu.dimension_semantics<parallel>], iteration_bounds = array<i64: 2>, scalar_prefetch = 0 : i64, scratch_operands = 0 : i64, tpu.core_type = #tpu.core_type<tc>, window_params = [{transform_indices = @transform_0, window_bounds = array<i64: 1, 9, 2, 9, 8>}, {pipeline_mode = #tpu.pipeline_mode<synchronous>, transform_indices = @transform_1, window_bounds = array<i64: 3, 8, 8>}, {pipeline_mode = #tpu.pipeline_mode<synchronous>, transform_indices = @transform_2, window_bounds = array<i64: 3, 4, 8>}, {pipeline_mode = #tpu.pipeline_mode<synchronous>, transform_indices = @transform_3, window_bounds = array<i64: 1, 8>}, {transform_indices = @transform_4, window_bounds = array<i64: 1, 8, 8, 8>}]} {
    %cst = arith.constant 0.000000e+00 : f32
    %0 = vector.broadcast %cst : f32 to vector<64x8xf32>
    %c0 = arith.constant 0 : index
    %c0_0 = arith.constant 0 : index
    %c0_1 = arith.constant 0 : index
    %c0_2 = arith.constant 0 : index
    %c0_3 = arith.constant 0 : index
    %1 = vector.load %arg1[%c0, %c0_0, %c0_1, %c0_2, %c0_3] : memref<1x9x2x9x8xf32, #tpu.memory_space<vmem>>, vector<1x8x1x8x8xf32>
    %2 = vector.shape_cast %1 : vector<1x8x1x8x8xf32> to vector<8x8x8xf32>
    %3 = vector.shape_cast %2 : vector<8x8x8xf32> to vector<64x8xf32>
    %c0_4 = arith.constant 0 : index
    %c0_5 = arith.constant 0 : index
    %c0_6 = arith.constant 0 : index
    %4 = vector.load %arg2[%c0_4, %c0_5, %c0_6] : memref<3x8x8xf32, #tpu.memory_space<vmem>>, vector<1x8x8xf32>
    %5 = vector.shape_cast %4 : vector<1x8x8xf32> to vector<8x8xf32>
    %cst_7 = arith.constant dense<0.000000e+00> : vector<64x8xf32>
    %6 = tpu.matmul %3, %5, %cst_7 {dimension_numbers = #tpu.dot_dimension_numbers<[1], [0], [0], [1], [0, 0, 1, 1], [], []>} : vector<64x8xf32>, vector<8x8xf32>, vector<64x8xf32> -> vector<64x8xf32>
    %7 = arith.addf %0, %6 : vector<64x8xf32>
    %c0_8 = arith.constant 0 : index
    %c0_9 = arith.constant 0 : index
    %c0_10 = arith.constant 0 : index
    %c1 = arith.constant 1 : index
    %c0_11 = arith.constant 0 : index
    %8 = vector.load %arg1[%c0_8, %c0_9, %c0_10, %c1, %c0_11] : memref<1x9x2x9x8xf32, #tpu.memory_space<vmem>>, vector<1x8x1x8x4xf32>
    %9 = vector.shape_cast %8 : vector<1x8x1x8x4xf32> to vector<8x8x4xf32>
    %10 = vector.shape_cast %9 : vector<8x8x4xf32> to vector<64x4xf32>
    %c0_12 = arith.constant 0 : index
    %c0_13 = arith.constant 0 : index
    %c0_14 = arith.constant 0 : index
    %11 = vector.load %arg3[%c0_12, %c0_13, %c0_14] : memref<3x4x8xf32, #tpu.memory_space<vmem>>, vector<1x4x8xf32>
    %12 = vector.shape_cast %11 : vector<1x4x8xf32> to vector<4x8xf32>
    %cst_15 = arith.constant dense<0.000000e+00> : vector<64x8xf32>
    %13 = tpu.matmul %10, %12, %cst_15 {dimension_numbers = #tpu.dot_dimension_numbers<[1], [0], [0], [1], [0, 0, 1, 1], [], []>} : vector<64x4xf32>, vector<4x8xf32>, vector<64x8xf32> -> vector<64x8xf32>
    %14 = arith.addf %7, %13 : vector<64x8xf32>
    %c0_16 = arith.constant 0 : index
    %c0_17 = arith.constant 0 : index
    %c1_18 = arith.constant 1 : index
    %c0_19 = arith.constant 0 : index
    %c0_20 = arith.constant 0 : index
    %15 = vector.load %arg1[%c0_16, %c0_17, %c1_18, %c0_19, %c0_20] : memref<1x9x2x9x8xf32, #tpu.memory_space<vmem>>, vector<1x8x1x8x8xf32>
    %16 = vector.shape_cast %15 : vector<1x8x1x8x8xf32> to vector<8x8x8xf32>
    %17 = vector.shape_cast %16 : vector<8x8x8xf32> to vector<64x8xf32>
    %c1_21 = arith.constant 1 : index
    %c0_22 = arith.constant 0 : index
    %c0_23 = arith.constant 0 : index
    %18 = vector.load %arg2[%c1_21, %c0_22, %c0_23] : memref<3x8x8xf32, #tpu.memory_space<vmem>>, vector<1x8x8xf32>
    %19 = vector.shape_cast %18 : vector<1x8x8xf32> to vector<8x8xf32>
    %cst_24 = arith.constant dense<0.000000e+00> : vector<64x8xf32>
    %20 = tpu.matmul %17, %19, %cst_24 {dimension_numbers = #tpu.dot_dimension_numbers<[1], [0], [0], [1], [0, 0, 1, 1], [], []>} : vector<64x8xf32>, vector<8x8xf32>, vector<64x8xf32> -> vector<64x8xf32>
    %21 = arith.addf %14, %20 : vector<64x8xf32>
    %c0_25 = arith.constant 0 : index
    %c0_26 = arith.constant 0 : index
    %c1_27 = arith.constant 1 : index
    %c1_28 = arith.constant 1 : index
    %c0_29 = arith.constant 0 : index
    %22 = vector.load %arg1[%c0_25, %c0_26, %c1_27, %c1_28, %c0_29] : memref<1x9x2x9x8xf32, #tpu.memory_space<vmem>>, vector<1x8x1x8x4xf32>
    %23 = vector.shape_cast %22 : vector<1x8x1x8x4xf32> to vector<8x8x4xf32>
    %24 = vector.shape_cast %23 : vector<8x8x4xf32> to vector<64x4xf32>
    %c1_30 = arith.constant 1 : index
    %c0_31 = arith.constant 0 : index
    %c0_32 = arith.constant 0 : index
    %25 = vector.load %arg3[%c1_30, %c0_31, %c0_32] : memref<3x4x8xf32, #tpu.memory_space<vmem>>, vector<1x4x8xf32>
    %26 = vector.shape_cast %25 : vector<1x4x8xf32> to vector<4x8xf32>
    %cst_33 = arith.constant dense<0.000000e+00> : vector<64x8xf32>
    %27 = tpu.matmul %24, %26, %cst_33 {dimension_numbers = #tpu.dot_dimension_numbers<[1], [0], [0], [1], [0, 0, 1, 1], [], []>} : vector<64x4xf32>, vector<4x8xf32>, vector<64x8xf32> -> vector<64x8xf32>
    %28 = arith.addf %21, %27 : vector<64x8xf32>
    %c0_34 = arith.constant 0 : index
    %c1_35 = arith.constant 1 : index
    %c0_36 = arith.constant 0 : index
    %c0_37 = arith.constant 0 : index
    %c0_38 = arith.constant 0 : index
    %29 = vector.load %arg1[%c0_34, %c1_35, %c0_36, %c0_37, %c0_38] : memref<1x9x2x9x8xf32, #tpu.memory_space<vmem>>, vector<1x8x1x8x8xf32>
    %30 = vector.shape_cast %29 : vector<1x8x1x8x8xf32> to vector<8x8x8xf32>
    %31 = vector.shape_cast %30 : vector<8x8x8xf32> to vector<64x8xf32>
    %c2 = arith.constant 2 : index
    %c0_39 = arith.constant 0 : index
    %c0_40 = arith.constant 0 : index
    %32 = vector.load %arg2[%c2, %c0_39, %c0_40] : memref<3x8x8xf32, #tpu.memory_space<vmem>>, vector<1x8x8xf32>
    %33 = vector.shape_cast %32 : vector<1x8x8xf32> to vector<8x8xf32>
    %cst_41 = arith.constant dense<0.000000e+00> : vector<64x8xf32>
    %34 = tpu.matmul %31, %33, %cst_41 {dimension_numbers = #tpu.dot_dimension_numbers<[1], [0], [0], [1], [0, 0, 1, 1], [], []>} : vector<64x8xf32>, vector<8x8xf32>, vector<64x8xf32> -> vector<64x8xf32>
    %35 = arith.addf %28, %34 : vector<64x8xf32>
    %c0_42 = arith.constant 0 : index
    %c1_43 = arith.constant 1 : index
    %c0_44 = arith.constant 0 : index
    %c1_45 = arith.constant 1 : index
    %c0_46 = arith.constant 0 : index
    %36 = vector.load %arg1[%c0_42, %c1_43, %c0_44, %c1_45, %c0_46] : memref<1x9x2x9x8xf32, #tpu.memory_space<vmem>>, vector<1x8x1x8x4xf32>
    %37 = vector.shape_cast %36 : vector<1x8x1x8x4xf32> to vector<8x8x4xf32>
    %38 = vector.shape_cast %37 : vector<8x8x4xf32> to vector<64x4xf32>
    %c2_47 = arith.constant 2 : index
    %c0_48 = arith.constant 0 : index
    %c0_49 = arith.constant 0 : index
    %39 = vector.load %arg3[%c2_47, %c0_48, %c0_49] : memref<3x4x8xf32, #tpu.memory_space<vmem>>, vector<1x4x8xf32>
    %40 = vector.shape_cast %39 : vector<1x4x8xf32> to vector<4x8xf32>
    %cst_50 = arith.constant dense<0.000000e+00> : vector<64x8xf32>
    %41 = tpu.matmul %38, %40, %cst_50 {dimension_numbers = #tpu.dot_dimension_numbers<[1], [0], [0], [1], [0, 0, 1, 1], [], []>} : vector<64x4xf32>, vector<4x8xf32>, vector<64x8xf32> -> vector<64x8xf32>
    %42 = arith.addf %35, %41 : vector<64x8xf32>
    %c0_51 = arith.constant 0 : index
    %c0_52 = arith.constant 0 : index
    %43 = vector.load %arg4[%c0_51, %c0_52] : memref<1x8xf32, #tpu.memory_space<vmem>>, vector<1x8xf32>
    %44 = vector.broadcast %43 : vector<1x8xf32> to vector<64x8xf32>
    %45 = arith.addf %42, %44 : vector<64x8xf32>
    %cst_53 = arith.constant 0.000000e+00 : f32
    %46 = vector.broadcast %cst_53 : f32 to vector<64x8xf32>
    %47 = arith.maximumf %45, %46 : vector<64x8xf32>
    %48 = vector.shape_cast %47 : vector<64x8xf32> to vector<8x8x8xf32>
    %c0_54 = arith.constant 0 : index
    %c0_55 = arith.constant 0 : index
    %c0_56 = arith.constant 0 : index
    %c0_57 = arith.constant 0 : index
    %49 = vector.load %arg5[%c0_54, %c0_55, %c0_56, %c0_57] : memref<1x8x8x8xf32, #tpu.memory_space<vmem>>, vector<1x8x8x8xf32>
    %50 = vector.shape_cast %49 : vector<1x8x8x8xf32> to vector<8x8x8xf32>
    %51 = vector.shape_cast %48 : vector<8x8x8xf32> to vector<1x8x8x8xf32>
    tpu.vector_store %arg5[%c0_54, %c0_55, %c0_56, %c0_57], %51 {strides = array<i32>} : memref<1x8x8x8xf32, #tpu.memory_space<vmem>>, vector<1x8x8x8xf32>,
    return
  }
  func.func @transform_0(%arg0: i32) -> (i32, i32, i32, i32, i32) {
    %c0_i32 = arith.constant 0 : i32
    %c0_i32_0 = arith.constant 0 : i32
    %c0_i32_1 = arith.constant 0 : i32
    %c0_i32_2 = arith.constant 0 : i32
    %c0_i32_3 = arith.constant 0 : i32
    return %arg0, %c0_i32, %c0_i32_0, %c0_i32_1, %c0_i32_2 : i32, i32, i32, i32, i32
  }
  func.func @transform_1(%arg0: i32) -> (i32, i32, i32) {
    %c0_i32 = arith.constant 0 : i32
    %c0_i32_0 = arith.constant 0 : i32
    %c0_i32_1 = arith.constant 0 : i32
    %c0_i32_2 = arith.constant 0 : i32
    return %c0_i32, %c0_i32_0, %c0_i32_1 : i32, i32, i32
  }
  func.func @transform_2(%arg0: i32) -> (i32, i32, i32) {
    %c0_i32 = arith.constant 0 : i32
    %c0_i32_0 = arith.constant 0 : i32
    %c0_i32_1 = arith.constant 0 : i32
    %c0_i32_2 = arith.constant 0 : i32
    return %c0_i32, %c0_i32_0, %c0_i32_1 : i32, i32, i32
  }
  func.func @transform_3(%arg0: i32) -> (i32, i32) {
    %c0_i32 = arith.constant 0 : i32
    %c0_i32_0 = arith.constant 0 : i32
    %c0_i32_1 = arith.constant 0 : i32
    return %c0_i32, %c0_i32_0 : i32, i32
  }
  func.func @transform_4(%arg0: i32) -> (i32, i32, i32, i32) {
    %c0_i32 = arith.constant 0 : i32
    %c0_i32_0 = arith.constant 0 : i32
    %c0_i32_1 = arith.constant 0 : i32
    %c0_i32_2 = arith.constant 0 : i32
    return %arg0, %c0_i32, %c0_i32_0, %c0_i32_1 : i32, i32, i32, i32
  }
}

module attributes {stable_mosaic.version = 11 : i64} {
  func.func @_conv3x3_s2_kernel(%arg0: i32, %arg1: memref<1x5x2x9x16xf32, #tpu.memory_space<vmem>>, %arg2: memref<3x16x16xf32, #tpu.memory_space<vmem>>, %arg3: memref<3x8x16xf32, #tpu.memory_space<vmem>>, %arg4: memref<1x16xf32, #tpu.memory_space<vmem>>, %arg5: memref<1x4x8x16xf32, #tpu.memory_space<vmem>>) attributes {dimension_semantics = [#tpu.dimension_semantics<parallel>], iteration_bounds = array<i64: 2>, scalar_prefetch = 0 : i64, scratch_operands = 0 : i64, tpu.core_type = #tpu.core_type<tc>, window_params = [{transform_indices = @transform_0, window_bounds = array<i64: 1, 5, 2, 9, 16>}, {pipeline_mode = #tpu.pipeline_mode<synchronous>, transform_indices = @transform_1, window_bounds = array<i64: 3, 16, 16>}, {pipeline_mode = #tpu.pipeline_mode<synchronous>, transform_indices = @transform_2, window_bounds = array<i64: 3, 8, 16>}, {pipeline_mode = #tpu.pipeline_mode<synchronous>, transform_indices = @transform_3, window_bounds = array<i64: 1, 16>}, {transform_indices = @transform_4, window_bounds = array<i64: 1, 4, 8, 16>}]} {
    %cst = arith.constant 0.000000e+00 : f32
    %0 = vector.broadcast %cst : f32 to vector<32x16xf32>
    %c0 = arith.constant 0 : index
    %c0_0 = arith.constant 0 : index
    %c0_1 = arith.constant 0 : index
    %c0_2 = arith.constant 0 : index
    %c0_3 = arith.constant 0 : index
    %1 = vector.load %arg1[%c0, %c0_0, %c0_1, %c0_2, %c0_3] : memref<1x5x2x9x16xf32, #tpu.memory_space<vmem>>, vector<1x4x1x8x16xf32>
    %2 = vector.shape_cast %1 : vector<1x4x1x8x16xf32> to vector<4x8x16xf32>
    %3 = vector.shape_cast %2 : vector<4x8x16xf32> to vector<32x16xf32>
    %c0_4 = arith.constant 0 : index
    %c0_5 = arith.constant 0 : index
    %c0_6 = arith.constant 0 : index
    %4 = vector.load %arg2[%c0_4, %c0_5, %c0_6] : memref<3x16x16xf32, #tpu.memory_space<vmem>>, vector<1x16x16xf32>
    %5 = vector.shape_cast %4 : vector<1x16x16xf32> to vector<16x16xf32>
    %cst_7 = arith.constant dense<0.000000e+00> : vector<32x16xf32>
    %6 = tpu.matmul %3, %5, %cst_7 {dimension_numbers = #tpu.dot_dimension_numbers<[1], [0], [0], [1], [0, 0, 1, 1], [], []>} : vector<32x16xf32>, vector<16x16xf32>, vector<32x16xf32> -> vector<32x16xf32>
    %7 = arith.addf %0, %6 : vector<32x16xf32>
    %c0_8 = arith.constant 0 : index
    %c0_9 = arith.constant 0 : index
    %c0_10 = arith.constant 0 : index
    %c1 = arith.constant 1 : index
    %c0_11 = arith.constant 0 : index
    %8 = vector.load %arg1[%c0_8, %c0_9, %c0_10, %c1, %c0_11] : memref<1x5x2x9x16xf32, #tpu.memory_space<vmem>>, vector<1x4x1x8x8xf32>
    %9 = vector.shape_cast %8 : vector<1x4x1x8x8xf32> to vector<4x8x8xf32>
    %10 = vector.shape_cast %9 : vector<4x8x8xf32> to vector<32x8xf32>
    %c0_12 = arith.constant 0 : index
    %c0_13 = arith.constant 0 : index
    %c0_14 = arith.constant 0 : index
    %11 = vector.load %arg3[%c0_12, %c0_13, %c0_14] : memref<3x8x16xf32, #tpu.memory_space<vmem>>, vector<1x8x16xf32>
    %12 = vector.shape_cast %11 : vector<1x8x16xf32> to vector<8x16xf32>
    %cst_15 = arith.constant dense<0.000000e+00> : vector<32x16xf32>
    %13 = tpu.matmul %10, %12, %cst_15 {dimension_numbers = #tpu.dot_dimension_numbers<[1], [0], [0], [1], [0, 0, 1, 1], [], []>} : vector<32x8xf32>, vector<8x16xf32>, vector<32x16xf32> -> vector<32x16xf32>
    %14 = arith.addf %7, %13 : vector<32x16xf32>
    %c0_16 = arith.constant 0 : index
    %c0_17 = arith.constant 0 : index
    %c1_18 = arith.constant 1 : index
    %c0_19 = arith.constant 0 : index
    %c0_20 = arith.constant 0 : index
    %15 = vector.load %arg1[%c0_16, %c0_17, %c1_18, %c0_19, %c0_20] : memref<1x5x2x9x16xf32, #tpu.memory_space<vmem>>, vector<1x4x1x8x16xf32>
    %16 = vector.shape_cast %15 : vector<1x4x1x8x16xf32> to vector<4x8x16xf32>
    %17 = vector.shape_cast %16 : vector<4x8x16xf32> to vector<32x16xf32>
    %c1_21 = arith.constant 1 : index
    %c0_22 = arith.constant 0 : index
    %c0_23 = arith.constant 0 : index
    %18 = vector.load %arg2[%c1_21, %c0_22, %c0_23] : memref<3x16x16xf32, #tpu.memory_space<vmem>>, vector<1x16x16xf32>
    %19 = vector.shape_cast %18 : vector<1x16x16xf32> to vector<16x16xf32>
    %cst_24 = arith.constant dense<0.000000e+00> : vector<32x16xf32>
    %20 = tpu.matmul %17, %19, %cst_24 {dimension_numbers = #tpu.dot_dimension_numbers<[1], [0], [0], [1], [0, 0, 1, 1], [], []>} : vector<32x16xf32>, vector<16x16xf32>, vector<32x16xf32> -> vector<32x16xf32>
    %21 = arith.addf %14, %20 : vector<32x16xf32>
    %c0_25 = arith.constant 0 : index
    %c0_26 = arith.constant 0 : index
    %c1_27 = arith.constant 1 : index
    %c1_28 = arith.constant 1 : index
    %c0_29 = arith.constant 0 : index
    %22 = vector.load %arg1[%c0_25, %c0_26, %c1_27, %c1_28, %c0_29] : memref<1x5x2x9x16xf32, #tpu.memory_space<vmem>>, vector<1x4x1x8x8xf32>
    %23 = vector.shape_cast %22 : vector<1x4x1x8x8xf32> to vector<4x8x8xf32>
    %24 = vector.shape_cast %23 : vector<4x8x8xf32> to vector<32x8xf32>
    %c1_30 = arith.constant 1 : index
    %c0_31 = arith.constant 0 : index
    %c0_32 = arith.constant 0 : index
    %25 = vector.load %arg3[%c1_30, %c0_31, %c0_32] : memref<3x8x16xf32, #tpu.memory_space<vmem>>, vector<1x8x16xf32>
    %26 = vector.shape_cast %25 : vector<1x8x16xf32> to vector<8x16xf32>
    %cst_33 = arith.constant dense<0.000000e+00> : vector<32x16xf32>
    %27 = tpu.matmul %24, %26, %cst_33 {dimension_numbers = #tpu.dot_dimension_numbers<[1], [0], [0], [1], [0, 0, 1, 1], [], []>} : vector<32x8xf32>, vector<8x16xf32>, vector<32x16xf32> -> vector<32x16xf32>
    %28 = arith.addf %21, %27 : vector<32x16xf32>
    %c0_34 = arith.constant 0 : index
    %c1_35 = arith.constant 1 : index
    %c0_36 = arith.constant 0 : index
    %c0_37 = arith.constant 0 : index
    %c0_38 = arith.constant 0 : index
    %29 = vector.load %arg1[%c0_34, %c1_35, %c0_36, %c0_37, %c0_38] : memref<1x5x2x9x16xf32, #tpu.memory_space<vmem>>, vector<1x4x1x8x16xf32>
    %30 = vector.shape_cast %29 : vector<1x4x1x8x16xf32> to vector<4x8x16xf32>
    %31 = vector.shape_cast %30 : vector<4x8x16xf32> to vector<32x16xf32>
    %c2 = arith.constant 2 : index
    %c0_39 = arith.constant 0 : index
    %c0_40 = arith.constant 0 : index
    %32 = vector.load %arg2[%c2, %c0_39, %c0_40] : memref<3x16x16xf32, #tpu.memory_space<vmem>>, vector<1x16x16xf32>
    %33 = vector.shape_cast %32 : vector<1x16x16xf32> to vector<16x16xf32>
    %cst_41 = arith.constant dense<0.000000e+00> : vector<32x16xf32>
    %34 = tpu.matmul %31, %33, %cst_41 {dimension_numbers = #tpu.dot_dimension_numbers<[1], [0], [0], [1], [0, 0, 1, 1], [], []>} : vector<32x16xf32>, vector<16x16xf32>, vector<32x16xf32> -> vector<32x16xf32>
    %35 = arith.addf %28, %34 : vector<32x16xf32>
    %c0_42 = arith.constant 0 : index
    %c1_43 = arith.constant 1 : index
    %c0_44 = arith.constant 0 : index
    %c1_45 = arith.constant 1 : index
    %c0_46 = arith.constant 0 : index
    %36 = vector.load %arg1[%c0_42, %c1_43, %c0_44, %c1_45, %c0_46] : memref<1x5x2x9x16xf32, #tpu.memory_space<vmem>>, vector<1x4x1x8x8xf32>
    %37 = vector.shape_cast %36 : vector<1x4x1x8x8xf32> to vector<4x8x8xf32>
    %38 = vector.shape_cast %37 : vector<4x8x8xf32> to vector<32x8xf32>
    %c2_47 = arith.constant 2 : index
    %c0_48 = arith.constant 0 : index
    %c0_49 = arith.constant 0 : index
    %39 = vector.load %arg3[%c2_47, %c0_48, %c0_49] : memref<3x8x16xf32, #tpu.memory_space<vmem>>, vector<1x8x16xf32>
    %40 = vector.shape_cast %39 : vector<1x8x16xf32> to vector<8x16xf32>
    %cst_50 = arith.constant dense<0.000000e+00> : vector<32x16xf32>
    %41 = tpu.matmul %38, %40, %cst_50 {dimension_numbers = #tpu.dot_dimension_numbers<[1], [0], [0], [1], [0, 0, 1, 1], [], []>} : vector<32x8xf32>, vector<8x16xf32>, vector<32x16xf32> -> vector<32x16xf32>
    %42 = arith.addf %35, %41 : vector<32x16xf32>
    %c0_51 = arith.constant 0 : index
    %c0_52 = arith.constant 0 : index
    %43 = vector.load %arg4[%c0_51, %c0_52] : memref<1x16xf32, #tpu.memory_space<vmem>>, vector<1x16xf32>
    %44 = vector.broadcast %43 : vector<1x16xf32> to vector<32x16xf32>
    %45 = arith.addf %42, %44 : vector<32x16xf32>
    %cst_53 = arith.constant 0.000000e+00 : f32
    %46 = vector.broadcast %cst_53 : f32 to vector<32x16xf32>
    %47 = arith.maximumf %45, %46 : vector<32x16xf32>
    %48 = vector.shape_cast %47 : vector<32x16xf32> to vector<4x8x16xf32>
    %c0_54 = arith.constant 0 : index
    %c0_55 = arith.constant 0 : index
    %c0_56 = arith.constant 0 : index
    %c0_57 = arith.constant 0 : index
    %49 = vector.load %arg5[%c0_54, %c0_55, %c0_56, %c0_57] : memref<1x4x8x16xf32, #tpu.memory_space<vmem>>, vector<1x4x8x16xf32>
    %50 = vector.shape_cast %49 : vector<1x4x8x16xf32> to vector<4x8x16xf32>
    %51 = vector.shape_cast %48 : vector<4x8x16xf32> to vector<1x4x8x16xf32>
    tpu.vector_store %arg5[%c0_54, %c0_55, %c0_56, %c0_57], %51 {strides = array<i32>} : memref<1x4x8x16xf32, #tpu.memory_space<vmem>>, vector<1x4x8x16xf32>,
    return
  }
  func.func @transform_0(%arg0: i32) -> (i32, i32, i32, i32, i32) {
    %c0_i32 = arith.constant 0 : i32
    %c0_i32_0 = arith.constant 0 : i32
    %c0_i32_1 = arith.constant 0 : i32
    %c0_i32_2 = arith.constant 0 : i32
    %c0_i32_3 = arith.constant 0 : i32
    return %arg0, %c0_i32, %c0_i32_0, %c0_i32_1, %c0_i32_2 : i32, i32, i32, i32, i32
  }
  func.func @transform_1(%arg0: i32) -> (i32, i32, i32) {
    %c0_i32 = arith.constant 0 : i32
    %c0_i32_0 = arith.constant 0 : i32
    %c0_i32_1 = arith.constant 0 : i32
    %c0_i32_2 = arith.constant 0 : i32
    return %c0_i32, %c0_i32_0, %c0_i32_1 : i32, i32, i32
  }
  func.func @transform_2(%arg0: i32) -> (i32, i32, i32) {
    %c0_i32 = arith.constant 0 : i32
    %c0_i32_0 = arith.constant 0 : i32
    %c0_i32_1 = arith.constant 0 : i32
    %c0_i32_2 = arith.constant 0 : i32
    return %c0_i32, %c0_i32_0, %c0_i32_1 : i32, i32, i32
  }
  func.func @transform_3(%arg0: i32) -> (i32, i32) {
    %c0_i32 = arith.constant 0 : i32
    %c0_i32_0 = arith.constant 0 : i32
    %c0_i32_1 = arith.constant 0 : i32
    return %c0_i32, %c0_i32_0 : i32, i32
  }
  func.func @transform_4(%arg0: i32) -> (i32, i32, i32, i32) {
    %c0_i32 = arith.constant 0 : i32
    %c0_i32_0 = arith.constant 0 : i32
    %c0_i32_1 = arith.constant 0 : i32
    %c0_i32_2 = arith.constant 0 : i32
    return %arg0, %c0_i32, %c0_i32_0, %c0_i32_1 : i32, i32, i32, i32
  }
}

module attributes {stable_mosaic.version = 11 : i64} {
  func.func @_conv3x3_s2_kernel(%arg0: i32, %arg1: memref<1x3x2x9x32xf32, #tpu.memory_space<vmem>>, %arg2: memref<3x32x16xf32, #tpu.memory_space<vmem>>, %arg3: memref<3x16x16xf32, #tpu.memory_space<vmem>>, %arg4: memref<1x16xf32, #tpu.memory_space<vmem>>, %arg5: memref<1x2x8x16xf32, #tpu.memory_space<vmem>>) attributes {dimension_semantics = [#tpu.dimension_semantics<parallel>], iteration_bounds = array<i64: 2>, scalar_prefetch = 0 : i64, scratch_operands = 0 : i64, tpu.core_type = #tpu.core_type<tc>, window_params = [{transform_indices = @transform_0, window_bounds = array<i64: 1, 3, 2, 9, 32>}, {pipeline_mode = #tpu.pipeline_mode<synchronous>, transform_indices = @transform_1, window_bounds = array<i64: 3, 32, 16>}, {pipeline_mode = #tpu.pipeline_mode<synchronous>, transform_indices = @transform_2, window_bounds = array<i64: 3, 16, 16>}, {pipeline_mode = #tpu.pipeline_mode<synchronous>, transform_indices = @transform_3, window_bounds = array<i64: 1, 16>}, {transform_indices = @transform_4, window_bounds = array<i64: 1, 2, 8, 16>}]} {
    %cst = arith.constant 0.000000e+00 : f32
    %0 = vector.broadcast %cst : f32 to vector<16x16xf32>
    %c0 = arith.constant 0 : index
    %c0_0 = arith.constant 0 : index
    %c0_1 = arith.constant 0 : index
    %c0_2 = arith.constant 0 : index
    %c0_3 = arith.constant 0 : index
    %1 = vector.load %arg1[%c0, %c0_0, %c0_1, %c0_2, %c0_3] : memref<1x3x2x9x32xf32, #tpu.memory_space<vmem>>, vector<1x2x1x8x32xf32>
    %2 = vector.shape_cast %1 : vector<1x2x1x8x32xf32> to vector<2x8x32xf32>
    %3 = vector.shape_cast %2 : vector<2x8x32xf32> to vector<16x32xf32>
    %c0_4 = arith.constant 0 : index
    %c0_5 = arith.constant 0 : index
    %c0_6 = arith.constant 0 : index
    %4 = vector.load %arg2[%c0_4, %c0_5, %c0_6] : memref<3x32x16xf32, #tpu.memory_space<vmem>>, vector<1x32x16xf32>
    %5 = vector.shape_cast %4 : vector<1x32x16xf32> to vector<32x16xf32>
    %cst_7 = arith.constant dense<0.000000e+00> : vector<16x16xf32>
    %6 = tpu.matmul %3, %5, %cst_7 {dimension_numbers = #tpu.dot_dimension_numbers<[1], [0], [0], [1], [0, 0, 1, 1], [], []>} : vector<16x32xf32>, vector<32x16xf32>, vector<16x16xf32> -> vector<16x16xf32>
    %7 = arith.addf %0, %6 : vector<16x16xf32>
    %c0_8 = arith.constant 0 : index
    %c0_9 = arith.constant 0 : index
    %c0_10 = arith.constant 0 : index
    %c1 = arith.constant 1 : index
    %c0_11 = arith.constant 0 : index
    %8 = vector.load %arg1[%c0_8, %c0_9, %c0_10, %c1, %c0_11] : memref<1x3x2x9x32xf32, #tpu.memory_space<vmem>>, vector<1x2x1x8x16xf32>
    %9 = vector.shape_cast %8 : vector<1x2x1x8x16xf32> to vector<2x8x16xf32>
    %10 = vector.shape_cast %9 : vector<2x8x16xf32> to vector<16x16xf32>
    %c0_12 = arith.constant 0 : index
    %c0_13 = arith.constant 0 : index
    %c0_14 = arith.constant 0 : index
    %11 = vector.load %arg3[%c0_12, %c0_13, %c0_14] : memref<3x16x16xf32, #tpu.memory_space<vmem>>, vector<1x16x16xf32>
    %12 = vector.shape_cast %11 : vector<1x16x16xf32> to vector<16x16xf32>
    %cst_15 = arith.constant dense<0.000000e+00> : vector<16x16xf32>
    %13 = tpu.matmul %10, %12, %cst_15 {dimension_numbers = #tpu.dot_dimension_numbers<[1], [0], [0], [1], [0, 0, 1, 1], [], []>} : vector<16x16xf32>, vector<16x16xf32>, vector<16x16xf32> -> vector<16x16xf32>
    %14 = arith.addf %7, %13 : vector<16x16xf32>
    %c0_16 = arith.constant 0 : index
    %c0_17 = arith.constant 0 : index
    %c1_18 = arith.constant 1 : index
    %c0_19 = arith.constant 0 : index
    %c0_20 = arith.constant 0 : index
    %15 = vector.load %arg1[%c0_16, %c0_17, %c1_18, %c0_19, %c0_20] : memref<1x3x2x9x32xf32, #tpu.memory_space<vmem>>, vector<1x2x1x8x32xf32>
    %16 = vector.shape_cast %15 : vector<1x2x1x8x32xf32> to vector<2x8x32xf32>
    %17 = vector.shape_cast %16 : vector<2x8x32xf32> to vector<16x32xf32>
    %c1_21 = arith.constant 1 : index
    %c0_22 = arith.constant 0 : index
    %c0_23 = arith.constant 0 : index
    %18 = vector.load %arg2[%c1_21, %c0_22, %c0_23] : memref<3x32x16xf32, #tpu.memory_space<vmem>>, vector<1x32x16xf32>
    %19 = vector.shape_cast %18 : vector<1x32x16xf32> to vector<32x16xf32>
    %cst_24 = arith.constant dense<0.000000e+00> : vector<16x16xf32>
    %20 = tpu.matmul %17, %19, %cst_24 {dimension_numbers = #tpu.dot_dimension_numbers<[1], [0], [0], [1], [0, 0, 1, 1], [], []>} : vector<16x32xf32>, vector<32x16xf32>, vector<16x16xf32> -> vector<16x16xf32>
    %21 = arith.addf %14, %20 : vector<16x16xf32>
    %c0_25 = arith.constant 0 : index
    %c0_26 = arith.constant 0 : index
    %c1_27 = arith.constant 1 : index
    %c1_28 = arith.constant 1 : index
    %c0_29 = arith.constant 0 : index
    %22 = vector.load %arg1[%c0_25, %c0_26, %c1_27, %c1_28, %c0_29] : memref<1x3x2x9x32xf32, #tpu.memory_space<vmem>>, vector<1x2x1x8x16xf32>
    %23 = vector.shape_cast %22 : vector<1x2x1x8x16xf32> to vector<2x8x16xf32>
    %24 = vector.shape_cast %23 : vector<2x8x16xf32> to vector<16x16xf32>
    %c1_30 = arith.constant 1 : index
    %c0_31 = arith.constant 0 : index
    %c0_32 = arith.constant 0 : index
    %25 = vector.load %arg3[%c1_30, %c0_31, %c0_32] : memref<3x16x16xf32, #tpu.memory_space<vmem>>, vector<1x16x16xf32>
    %26 = vector.shape_cast %25 : vector<1x16x16xf32> to vector<16x16xf32>
    %cst_33 = arith.constant dense<0.000000e+00> : vector<16x16xf32>
    %27 = tpu.matmul %24, %26, %cst_33 {dimension_numbers = #tpu.dot_dimension_numbers<[1], [0], [0], [1], [0, 0, 1, 1], [], []>} : vector<16x16xf32>, vector<16x16xf32>, vector<16x16xf32> -> vector<16x16xf32>
    %28 = arith.addf %21, %27 : vector<16x16xf32>
    %c0_34 = arith.constant 0 : index
    %c1_35 = arith.constant 1 : index
    %c0_36 = arith.constant 0 : index
    %c0_37 = arith.constant 0 : index
    %c0_38 = arith.constant 0 : index
    %29 = vector.load %arg1[%c0_34, %c1_35, %c0_36, %c0_37, %c0_38] : memref<1x3x2x9x32xf32, #tpu.memory_space<vmem>>, vector<1x2x1x8x32xf32>
    %30 = vector.shape_cast %29 : vector<1x2x1x8x32xf32> to vector<2x8x32xf32>
    %31 = vector.shape_cast %30 : vector<2x8x32xf32> to vector<16x32xf32>
    %c2 = arith.constant 2 : index
    %c0_39 = arith.constant 0 : index
    %c0_40 = arith.constant 0 : index
    %32 = vector.load %arg2[%c2, %c0_39, %c0_40] : memref<3x32x16xf32, #tpu.memory_space<vmem>>, vector<1x32x16xf32>
    %33 = vector.shape_cast %32 : vector<1x32x16xf32> to vector<32x16xf32>
    %cst_41 = arith.constant dense<0.000000e+00> : vector<16x16xf32>
    %34 = tpu.matmul %31, %33, %cst_41 {dimension_numbers = #tpu.dot_dimension_numbers<[1], [0], [0], [1], [0, 0, 1, 1], [], []>} : vector<16x32xf32>, vector<32x16xf32>, vector<16x16xf32> -> vector<16x16xf32>
    %35 = arith.addf %28, %34 : vector<16x16xf32>
    %c0_42 = arith.constant 0 : index
    %c1_43 = arith.constant 1 : index
    %c0_44 = arith.constant 0 : index
    %c1_45 = arith.constant 1 : index
    %c0_46 = arith.constant 0 : index
    %36 = vector.load %arg1[%c0_42, %c1_43, %c0_44, %c1_45, %c0_46] : memref<1x3x2x9x32xf32, #tpu.memory_space<vmem>>, vector<1x2x1x8x16xf32>
    %37 = vector.shape_cast %36 : vector<1x2x1x8x16xf32> to vector<2x8x16xf32>
    %38 = vector.shape_cast %37 : vector<2x8x16xf32> to vector<16x16xf32>
    %c2_47 = arith.constant 2 : index
    %c0_48 = arith.constant 0 : index
    %c0_49 = arith.constant 0 : index
    %39 = vector.load %arg3[%c2_47, %c0_48, %c0_49] : memref<3x16x16xf32, #tpu.memory_space<vmem>>, vector<1x16x16xf32>
    %40 = vector.shape_cast %39 : vector<1x16x16xf32> to vector<16x16xf32>
    %cst_50 = arith.constant dense<0.000000e+00> : vector<16x16xf32>
    %41 = tpu.matmul %38, %40, %cst_50 {dimension_numbers = #tpu.dot_dimension_numbers<[1], [0], [0], [1], [0, 0, 1, 1], [], []>} : vector<16x16xf32>, vector<16x16xf32>, vector<16x16xf32> -> vector<16x16xf32>
    %42 = arith.addf %35, %41 : vector<16x16xf32>
    %c0_51 = arith.constant 0 : index
    %c0_52 = arith.constant 0 : index
    %43 = vector.load %arg4[%c0_51, %c0_52] : memref<1x16xf32, #tpu.memory_space<vmem>>, vector<1x16xf32>
    %44 = vector.broadcast %43 : vector<1x16xf32> to vector<16x16xf32>
    %45 = arith.addf %42, %44 : vector<16x16xf32>
    %cst_53 = arith.constant 0.000000e+00 : f32
    %46 = vector.broadcast %cst_53 : f32 to vector<16x16xf32>
    %47 = arith.maximumf %45, %46 : vector<16x16xf32>
    %48 = vector.shape_cast %47 : vector<16x16xf32> to vector<2x8x16xf32>
    %c0_54 = arith.constant 0 : index
    %c0_55 = arith.constant 0 : index
    %c0_56 = arith.constant 0 : index
    %c0_57 = arith.constant 0 : index
    %49 = vector.load %arg5[%c0_54, %c0_55, %c0_56, %c0_57] : memref<1x2x8x16xf32, #tpu.memory_space<vmem>>, vector<1x2x8x16xf32>
    %50 = vector.shape_cast %49 : vector<1x2x8x16xf32> to vector<2x8x16xf32>
    %51 = vector.shape_cast %48 : vector<2x8x16xf32> to vector<1x2x8x16xf32>
    tpu.vector_store %arg5[%c0_54, %c0_55, %c0_56, %c0_57], %51 {strides = array<i32>} : memref<1x2x8x16xf32, #tpu.memory_space<vmem>>, vector<1x2x8x16xf32>,
    return
  }
  func.func @transform_0(%arg0: i32) -> (i32, i32, i32, i32, i32) {
    %c0_i32 = arith.constant 0 : i32
    %c0_i32_0 = arith.constant 0 : i32
    %c0_i32_1 = arith.constant 0 : i32
    %c0_i32_2 = arith.constant 0 : i32
    %c0_i32_3 = arith.constant 0 : i32
    return %arg0, %c0_i32, %c0_i32_0, %c0_i32_1, %c0_i32_2 : i32, i32, i32, i32, i32
  }
  func.func @transform_1(%arg0: i32) -> (i32, i32, i32) {
    %c0_i32 = arith.constant 0 : i32
    %c0_i32_0 = arith.constant 0 : i32
    %c0_i32_1 = arith.constant 0 : i32
    %c0_i32_2 = arith.constant 0 : i32
    return %c0_i32, %c0_i32_0, %c0_i32_1 : i32, i32, i32
  }
  func.func @transform_2(%arg0: i32) -> (i32, i32, i32) {
    %c0_i32 = arith.constant 0 : i32
    %c0_i32_0 = arith.constant 0 : i32
    %c0_i32_1 = arith.constant 0 : i32
    %c0_i32_2 = arith.constant 0 : i32
    return %c0_i32, %c0_i32_0, %c0_i32_1 : i32, i32, i32
  }
  func.func @transform_3(%arg0: i32) -> (i32, i32) {
    %c0_i32 = arith.constant 0 : i32
    %c0_i32_0 = arith.constant 0 : i32
    %c0_i32_1 = arith.constant 0 : i32
    return %c0_i32, %c0_i32_0 : i32, i32
  }
  func.func @transform_4(%arg0: i32) -> (i32, i32, i32, i32) {
    %c0_i32 = arith.constant 0 : i32
    %c0_i32_0 = arith.constant 0 : i32
    %c0_i32_1 = arith.constant 0 : i32
    %c0_i32_2 = arith.constant 0 : i32
    return %arg0, %c0_i32, %c0_i32_0, %c0_i32_1 : i32, i32, i32, i32
  }
}

module attributes {stable_mosaic.version = 11 : i64} {
  func.func @_cls_upsample_kernel(%arg0: i32, %arg1: memref<1x2x2x17xf32, #tpu.memory_space<vmem>>, %arg2: memref<5x17xf32, #tpu.memory_space<vmem>>, %arg3: memref<16x2xf32, #tpu.memory_space<vmem>>, %arg4: memref<2x16xf32, #tpu.memory_space<vmem>>, %arg5: memref<1x5x16x16xf32, #tpu.memory_space<vmem>>) attributes {dimension_semantics = [#tpu.dimension_semantics<parallel>], iteration_bounds = array<i64: 2>, scalar_prefetch = 0 : i64, scratch_operands = 0 : i64, tpu.core_type = #tpu.core_type<tc>, window_params = [{transform_indices = @transform_0, window_bounds = array<i64: 1, 2, 2, 17>}, {pipeline_mode = #tpu.pipeline_mode<synchronous>, transform_indices = @transform_1, window_bounds = array<i64: 5, 17>}, {pipeline_mode = #tpu.pipeline_mode<synchronous>, transform_indices = @transform_2, window_bounds = array<i64: 16, 2>}, {pipeline_mode = #tpu.pipeline_mode<synchronous>, transform_indices = @transform_3, window_bounds = array<i64: 2, 16>}, {transform_indices = @transform_4, window_bounds = array<i64: 1, 5, 16, 16>}]} {
    %c0 = arith.constant 0 : index
    %c0_0 = arith.constant 0 : index
    %c0_1 = arith.constant 0 : index
    %c0_2 = arith.constant 0 : index
    %0 = vector.load %arg1[%c0, %c0_0, %c0_1, %c0_2] : memref<1x2x2x17xf32, #tpu.memory_space<vmem>>, vector<1x2x2x17xf32>
    %1 = vector.shape_cast %0 : vector<1x2x2x17xf32> to vector<2x2x17xf32>
    %c0_3 = arith.constant 0 : index
    %c0_4 = arith.constant 0 : index
    %2 = vector.load %arg3[%c0_3, %c0_4] : memref<16x2xf32, #tpu.memory_space<vmem>>, vector<16x2xf32>
    %c0_5 = arith.constant 0 : index
    %c0_6 = arith.constant 0 : index
    %3 = vector.load %arg4[%c0_5, %c0_6] : memref<2x16xf32, #tpu.memory_space<vmem>>, vector<2x16xf32>
    %c0_7 = arith.constant 0 : index
    %c0_8 = arith.constant 0 : index
    %4 = vector.load %arg2[%c0_7, %c0_8] : memref<5x17xf32, #tpu.memory_space<vmem>>, vector<1x17xf32>
    %5 = vector.shape_cast %4 : vector<1x17xf32> to vector<17xf32>
    %6 = vector.shape_cast %5 : vector<17xf32> to vector<1x1x17xf32>
    %7 = vector.broadcast %6 : vector<1x1x17xf32> to vector<2x2x17xf32>
    %8 = arith.mulf %1, %7 : vector<2x2x17xf32>
    %cst = arith.constant dense<0.000000e+00> : vector<2x2xf32>
    %9 = vector.multi_reduction <add>, %8, %cst [2] : vector<2x2x17xf32> to vector<2x2xf32>
    %cst_9 = arith.constant dense<0.000000e+00> : vector<16x2xf32>
    %10 = tpu.matmul %2, %9, %cst_9 {dimension_numbers = #tpu.dot_dimension_numbers<[1], [0], [0], [1], [0, 0, 1, 1], [], []>} : vector<16x2xf32>, vector<2x2xf32>, vector<16x2xf32> -> vector<16x2xf32>
    %cst_10 = arith.constant dense<0.000000e+00> : vector<16x16xf32>
    %11 = tpu.matmul %10, %3, %cst_10 {dimension_numbers = #tpu.dot_dimension_numbers<[1], [0], [0], [1], [0, 0, 1, 1], [], []>} : vector<16x2xf32>, vector<2x16xf32>, vector<16x16xf32> -> vector<16x16xf32>
    %c0_11 = arith.constant 0 : index
    %c0_12 = arith.constant 0 : index
    %c0_13 = arith.constant 0 : index
    %c0_14 = arith.constant 0 : index
    %12 = vector.load %arg5[%c0_11, %c0_12, %c0_13, %c0_14] : memref<1x5x16x16xf32, #tpu.memory_space<vmem>>, vector<1x1x16x16xf32>
    %13 = vector.shape_cast %12 : vector<1x1x16x16xf32> to vector<16x16xf32>
    %14 = vector.shape_cast %11 : vector<16x16xf32> to vector<1x1x16x16xf32>
    tpu.vector_store %arg5[%c0_11, %c0_12, %c0_13, %c0_14], %14 {strides = array<i32>} : memref<1x5x16x16xf32, #tpu.memory_space<vmem>>, vector<1x1x16x16xf32>,
    %c1 = arith.constant 1 : index
    %c0_15 = arith.constant 0 : index
    %15 = vector.load %arg2[%c1, %c0_15] : memref<5x17xf32, #tpu.memory_space<vmem>>, vector<1x17xf32>
    %16 = vector.shape_cast %15 : vector<1x17xf32> to vector<17xf32>
    %17 = vector.shape_cast %16 : vector<17xf32> to vector<1x1x17xf32>
    %18 = vector.broadcast %17 : vector<1x1x17xf32> to vector<2x2x17xf32>
    %19 = arith.mulf %1, %18 : vector<2x2x17xf32>
    %cst_16 = arith.constant dense<0.000000e+00> : vector<2x2xf32>
    %20 = vector.multi_reduction <add>, %19, %cst_16 [2] : vector<2x2x17xf32> to vector<2x2xf32>
    %cst_17 = arith.constant dense<0.000000e+00> : vector<16x2xf32>
    %21 = tpu.matmul %2, %20, %cst_17 {dimension_numbers = #tpu.dot_dimension_numbers<[1], [0], [0], [1], [0, 0, 1, 1], [], []>} : vector<16x2xf32>, vector<2x2xf32>, vector<16x2xf32> -> vector<16x2xf32>
    %cst_18 = arith.constant dense<0.000000e+00> : vector<16x16xf32>
    %22 = tpu.matmul %21, %3, %cst_18 {dimension_numbers = #tpu.dot_dimension_numbers<[1], [0], [0], [1], [0, 0, 1, 1], [], []>} : vector<16x2xf32>, vector<2x16xf32>, vector<16x16xf32> -> vector<16x16xf32>
    %c0_19 = arith.constant 0 : index
    %c1_20 = arith.constant 1 : index
    %c0_21 = arith.constant 0 : index
    %c0_22 = arith.constant 0 : index
    %23 = vector.load %arg5[%c0_19, %c1_20, %c0_21, %c0_22] : memref<1x5x16x16xf32, #tpu.memory_space<vmem>>, vector<1x1x16x16xf32>
    %24 = vector.shape_cast %23 : vector<1x1x16x16xf32> to vector<16x16xf32>
    %25 = vector.shape_cast %22 : vector<16x16xf32> to vector<1x1x16x16xf32>
    tpu.vector_store %arg5[%c0_19, %c1_20, %c0_21, %c0_22], %25 {strides = array<i32>} : memref<1x5x16x16xf32, #tpu.memory_space<vmem>>, vector<1x1x16x16xf32>,
    %c2 = arith.constant 2 : index
    %c0_23 = arith.constant 0 : index
    %26 = vector.load %arg2[%c2, %c0_23] : memref<5x17xf32, #tpu.memory_space<vmem>>, vector<1x17xf32>
    %27 = vector.shape_cast %26 : vector<1x17xf32> to vector<17xf32>
    %28 = vector.shape_cast %27 : vector<17xf32> to vector<1x1x17xf32>
    %29 = vector.broadcast %28 : vector<1x1x17xf32> to vector<2x2x17xf32>
    %30 = arith.mulf %1, %29 : vector<2x2x17xf32>
    %cst_24 = arith.constant dense<0.000000e+00> : vector<2x2xf32>
    %31 = vector.multi_reduction <add>, %30, %cst_24 [2] : vector<2x2x17xf32> to vector<2x2xf32>
    %cst_25 = arith.constant dense<0.000000e+00> : vector<16x2xf32>
    %32 = tpu.matmul %2, %31, %cst_25 {dimension_numbers = #tpu.dot_dimension_numbers<[1], [0], [0], [1], [0, 0, 1, 1], [], []>} : vector<16x2xf32>, vector<2x2xf32>, vector<16x2xf32> -> vector<16x2xf32>
    %cst_26 = arith.constant dense<0.000000e+00> : vector<16x16xf32>
    %33 = tpu.matmul %32, %3, %cst_26 {dimension_numbers = #tpu.dot_dimension_numbers<[1], [0], [0], [1], [0, 0, 1, 1], [], []>} : vector<16x2xf32>, vector<2x16xf32>, vector<16x16xf32> -> vector<16x16xf32>
    %c0_27 = arith.constant 0 : index
    %c2_28 = arith.constant 2 : index
    %c0_29 = arith.constant 0 : index
    %c0_30 = arith.constant 0 : index
    %34 = vector.load %arg5[%c0_27, %c2_28, %c0_29, %c0_30] : memref<1x5x16x16xf32, #tpu.memory_space<vmem>>, vector<1x1x16x16xf32>
    %35 = vector.shape_cast %34 : vector<1x1x16x16xf32> to vector<16x16xf32>
    %36 = vector.shape_cast %33 : vector<16x16xf32> to vector<1x1x16x16xf32>
    tpu.vector_store %arg5[%c0_27, %c2_28, %c0_29, %c0_30], %36 {strides = array<i32>} : memref<1x5x16x16xf32, #tpu.memory_space<vmem>>, vector<1x1x16x16xf32>,
    %c3 = arith.constant 3 : index
    %c0_31 = arith.constant 0 : index
    %37 = vector.load %arg2[%c3, %c0_31] : memref<5x17xf32, #tpu.memory_space<vmem>>, vector<1x17xf32>
    %38 = vector.shape_cast %37 : vector<1x17xf32> to vector<17xf32>
    %39 = vector.shape_cast %38 : vector<17xf32> to vector<1x1x17xf32>
    %40 = vector.broadcast %39 : vector<1x1x17xf32> to vector<2x2x17xf32>
    %41 = arith.mulf %1, %40 : vector<2x2x17xf32>
    %cst_32 = arith.constant dense<0.000000e+00> : vector<2x2xf32>
    %42 = vector.multi_reduction <add>, %41, %cst_32 [2] : vector<2x2x17xf32> to vector<2x2xf32>
    %cst_33 = arith.constant dense<0.000000e+00> : vector<16x2xf32>
    %43 = tpu.matmul %2, %42, %cst_33 {dimension_numbers = #tpu.dot_dimension_numbers<[1], [0], [0], [1], [0, 0, 1, 1], [], []>} : vector<16x2xf32>, vector<2x2xf32>, vector<16x2xf32> -> vector<16x2xf32>
    %cst_34 = arith.constant dense<0.000000e+00> : vector<16x16xf32>
    %44 = tpu.matmul %43, %3, %cst_34 {dimension_numbers = #tpu.dot_dimension_numbers<[1], [0], [0], [1], [0, 0, 1, 1], [], []>} : vector<16x2xf32>, vector<2x16xf32>, vector<16x16xf32> -> vector<16x16xf32>
    %c0_35 = arith.constant 0 : index
    %c3_36 = arith.constant 3 : index
    %c0_37 = arith.constant 0 : index
    %c0_38 = arith.constant 0 : index
    %45 = vector.load %arg5[%c0_35, %c3_36, %c0_37, %c0_38] : memref<1x5x16x16xf32, #tpu.memory_space<vmem>>, vector<1x1x16x16xf32>
    %46 = vector.shape_cast %45 : vector<1x1x16x16xf32> to vector<16x16xf32>
    %47 = vector.shape_cast %44 : vector<16x16xf32> to vector<1x1x16x16xf32>
    tpu.vector_store %arg5[%c0_35, %c3_36, %c0_37, %c0_38], %47 {strides = array<i32>} : memref<1x5x16x16xf32, #tpu.memory_space<vmem>>, vector<1x1x16x16xf32>,
    %c4 = arith.constant 4 : index
    %c0_39 = arith.constant 0 : index
    %48 = vector.load %arg2[%c4, %c0_39] : memref<5x17xf32, #tpu.memory_space<vmem>>, vector<1x17xf32>
    %49 = vector.shape_cast %48 : vector<1x17xf32> to vector<17xf32>
    %50 = vector.shape_cast %49 : vector<17xf32> to vector<1x1x17xf32>
    %51 = vector.broadcast %50 : vector<1x1x17xf32> to vector<2x2x17xf32>
    %52 = arith.mulf %1, %51 : vector<2x2x17xf32>
    %cst_40 = arith.constant dense<0.000000e+00> : vector<2x2xf32>
    %53 = vector.multi_reduction <add>, %52, %cst_40 [2] : vector<2x2x17xf32> to vector<2x2xf32>
    %cst_41 = arith.constant dense<0.000000e+00> : vector<16x2xf32>
    %54 = tpu.matmul %2, %53, %cst_41 {dimension_numbers = #tpu.dot_dimension_numbers<[1], [0], [0], [1], [0, 0, 1, 1], [], []>} : vector<16x2xf32>, vector<2x2xf32>, vector<16x2xf32> -> vector<16x2xf32>
    %cst_42 = arith.constant dense<0.000000e+00> : vector<16x16xf32>
    %55 = tpu.matmul %54, %3, %cst_42 {dimension_numbers = #tpu.dot_dimension_numbers<[1], [0], [0], [1], [0, 0, 1, 1], [], []>} : vector<16x2xf32>, vector<2x16xf32>, vector<16x16xf32> -> vector<16x16xf32>
    %c0_43 = arith.constant 0 : index
    %c4_44 = arith.constant 4 : index
    %c0_45 = arith.constant 0 : index
    %c0_46 = arith.constant 0 : index
    %56 = vector.load %arg5[%c0_43, %c4_44, %c0_45, %c0_46] : memref<1x5x16x16xf32, #tpu.memory_space<vmem>>, vector<1x1x16x16xf32>
    %57 = vector.shape_cast %56 : vector<1x1x16x16xf32> to vector<16x16xf32>
    %58 = vector.shape_cast %55 : vector<16x16xf32> to vector<1x1x16x16xf32>
    tpu.vector_store %arg5[%c0_43, %c4_44, %c0_45, %c0_46], %58 {strides = array<i32>} : memref<1x5x16x16xf32, #tpu.memory_space<vmem>>, vector<1x1x16x16xf32>,
    return
  }
  func.func @transform_0(%arg0: i32) -> (i32, i32, i32, i32) {
    %c0_i32 = arith.constant 0 : i32
    %c0_i32_0 = arith.constant 0 : i32
    %c0_i32_1 = arith.constant 0 : i32
    %c0_i32_2 = arith.constant 0 : i32
    return %arg0, %c0_i32, %c0_i32_0, %c0_i32_1 : i32, i32, i32, i32
  }
  func.func @transform_1(%arg0: i32) -> (i32, i32) {
    %c0_i32 = arith.constant 0 : i32
    %c0_i32_0 = arith.constant 0 : i32
    %c0_i32_1 = arith.constant 0 : i32
    return %c0_i32, %c0_i32_0 : i32, i32
  }
  func.func @transform_2(%arg0: i32) -> (i32, i32) {
    %c0_i32 = arith.constant 0 : i32
    %c0_i32_0 = arith.constant 0 : i32
    %c0_i32_1 = arith.constant 0 : i32
    return %c0_i32, %c0_i32_0 : i32, i32
  }
  func.func @transform_3(%arg0: i32) -> (i32, i32) {
    %c0_i32 = arith.constant 0 : i32
    %c0_i32_0 = arith.constant 0 : i32
    %c0_i32_1 = arith.constant 0 : i32
    return %c0_i32, %c0_i32_0 : i32, i32
  }
  func.func @transform_4(%arg0: i32) -> (i32, i32, i32, i32) {
    %c0_i32 = arith.constant 0 : i32
    %c0_i32_0 = arith.constant 0 : i32
    %c0_i32_1 = arith.constant 0 : i32
    %c0_i32_2 = arith.constant 0 : i32
    return %arg0, %c0_i32, %c0_i32_0, %c0_i32_1 : i32, i32, i32, i32
  }
}

</mosaic_0001>

<bundles_post_ra>
// kernel: deeplab_v1_forward.5
= control target key start
LH: loop header
LB: loop body
LE: loop exit
PB: predicated region body
PF: predicated region fallthrough
CT: control target
= control target key end

     0   :  { %s1130_s15 = smov 0   ;;  %s1229_s0 = inlined_call_operand.vmem [shape: f32[2,5,2,9,16], index: 0, kind: input, shape index: {}]   ;;  %s1230_s1 = inlined_call_operand.vmem [shape: f32[3,16,16], index: 1, kind: input, shape index: {}]   ;;  %s1231_s2 = inlined_call_operand.vmem [shape: f32[3,8,16], index: 2, kind: input, shape index: {}]   ;;  %s1232_s3 = inlined_call_operand.vmem [shape: f32[1,16], index: 3, kind: input, shape index: {}]   ;;  %s1233_s4 = inlined_call_operand.vmem [shape: f32[2,4,8,16], index: 4, kind: output, shape index: {}]  }
   0x1 LB: > { %s911_s16 = sadd.s32 4294967295, %s1103_s15   ;;  %p915_p0 = scmp.ge.s32.totalorder %s1103_s15, 1  ;;  %s1103_s15 = sphi %s1130_s15, %s14_s15  }
   0x2   : > { %p162_p1 = scmp.lt.s32.totalorder %s1103_s15, 3 }
   0x4   : > { %p163_p2 = pnand %p915_p0, %p162_p1 }
   0x5   : > { %v208_v0 = vld [vmem:[%s1231_s2] sm:$0xff] (!%p163_p2)  ;;  %v941_v1 = vld [vmem:[%s1231_s2 + $0x8] sm:$0xff] (!%p163_p2)  ;;  %p188_p3 = scmp.lt.s32.totalorder (!%p163_p2), %s911_s16, 1  ;;  %vm209_vm0 = vcmask (!%p163_p2), 64512   ;;  %v931_v8 = vld [vmem:[%s1230_s1 + $0x10] sm:$0xff] (!%p163_p2)  ;;  %vm307_vm1 = vcmask (!%p163_p2), 130048  }
   0x6   : > { %166 = sbr.rel (%p163_p2) target bundleno = 259 (0x103), region = 36  ;;  %v202_v2 = vld [vmem:[%s1230_s1] sm:$0xff] (!%p163_p2)  ;;  %1002 = vmatprep.subr.mxu1 (!%p163_p2), %v208_v0  ;;  %1030 = vmatprep.subr.mxu0 (!%p163_p2), %v941_v1  ;;  %v203_v3 = vld [vmem:[%s1230_s1 + $0x8] sm:$0xff] (!%p163_p2)  ;;  %v932_v9 = vld [vmem:[%s1230_s1 + $0x18] sm:$0xff] (!%p163_p2) }
   0x7   : > { %v950_v4 = vld [vmem:[%s1230_s1 + $0x20] sm:$0xff] (!%p163_p2)  ;;  %v951_v5 = vld [vmem:[%s1230_s1 + $0x28] sm:$0xff] (!%p163_p2)  ;;  %1003 = vmatpush3.msra.mxu1 (!%p163_p2), %v208_v0  ;;  %1031 = vmatpush3.msra.mxu0 (!%p163_p2), %v941_v1  ;;  %v1056_v6 = vpack.c.bf16 (!%p163_p2), %v203_v3, %v202_v2  ;;  %v1060_v16 = vpack.c.bf16 (!%p163_p2), %v932_v9, %v931_v8  ;;  %v960_v17 = vld [vmem:[%s1231_s2 + $0x10] sm:$0xff] (!%p163_p2) }
   0x8   : > { %v1064_v7 = vpack.c.bf16 (!%p163_p2), %v951_v5, %v950_v4  ;;  %v965_v32 = vld [vmem:[%s1232_s3] ss:$0 sm:$0xff] (!%p163_p2) }
   0x9   : > { %1057 = vmatprep.subr.bf16.mxu1 (!%p163_p2), %v1056_v6 }
   0xa   : > { %1065 = vmatprep.subr.bf16.mxu0 (!%p163_p2), %v1064_v7 }
   0xd   : > { %s1235_s16 = smov (!%p188_p3, %s911_s16), 1 }
   0xe   : > { %s1088_s29 = smul.u32 160, %s1235_s16  ;;  %s968_s17 = sshll.u32 %s1235_s16, 5 }
   0xf   : > { %s197_s20 = scalar_lea.vmem %s1233_s4, %s968_s17 }
  0x10   : > { %s1168_s10 = scalar_lea.vmem %s1229_s0, %s1088_s29 }
  0x11   : > { %v204_v10 = vld [vmem:[%s1168_s10 + $0x1] sm:$0xff]  ;;  %v937_v11 = vld [vmem:[%s1168_s10 + $0x11] sm:$0xff] }
  0x12   : > { %v205_v12 = vld [vmem:[%s1168_s10 + $0x21] sm:$0xff]  ;;  %1004 = vmatprep.mubr.msk.f32.mxu1 %vm209_vm0, %v204_v10  ;;  %1032 = vmatprep.mubr.msk.f32.mxu0 %vm209_vm0, %v937_v11  ;;  %v938_v13 = vld [vmem:[%s1168_s10 + $0x31] sm:$0xff] }
  0x13   : > { %v206_v14 = vld [vmem:[%s1168_s10 + $0x41] sm:$0xff]  ;;  %v939_v15 = vld [vmem:[%s1168_s10 + $0x51] sm:$0xff]  ;;  %1005 = vmatmul.mubr.msk.f32.vlgmr.msra.gmra.mrb[0].mxu1 %vm209_vm0, %v205_v12  ;;  %1033 = vmatmul.mubr.msk.f32.vlgmr.msra.gmra.mrb[0].mxu0 %vm209_vm0, %v938_v13 }
  0x14   : > { %1059 = vmatpush3.bf16.msra.mxu1 %v1056_v6  ;;  %1067 = vmatpush3.bf16.msra.mxu0 %v1064_v7  ;;  %v207_v18 = vld [vmem:[%s1168_s10 + $0x61] sm:$0xff]  ;;  %v940_v19 = vld [vmem:[%s1168_s10 + $0x71] sm:$0xff] }
  0x15   : > { %1007 = vmatprep.mubr.msk.f32.mxu1 %vm209_vm0, %v206_v14  ;;  %1035 = vmatprep.mubr.msk.f32.mxu0 %vm209_vm0, %v939_v15  ;;  %v198_v20 = vld [vmem:[%s1168_s10] sm:$0xff]  ;;  %v927_v25 = vld [vmem:[%s1168_s10 + $0x10] sm:$0xff] }
  0x16   : > { %v946_v21 = vld [vmem:[%s1168_s10 + $0x20] sm:$0xff]  ;;  %1061 = vmatprep.subr.bf16.mxu1 %v1060_v16  ;;  %1048 = vmatprep.subr.mxu0 %v960_v17  ;;  %v928_v26 = vld [vmem:[%s1168_s10 + $0x30] sm:$0xff] }
  0x17   : > { %1008 = vmatmul.mubr.msk.f32.gmra.mrb[2].mxu1 %vm209_vm0, %v207_v18  ;;  %1036 = vmatmul.mubr.msk.f32.gmra.mrb[2].mxu0 %vm209_vm0, %v940_v19  ;;  %v947_v22 = vld [vmem:[%s1168_s10 + $0x40] sm:$0xff]  ;;  %v929_v27 = vld [vmem:[%s1168_s10 + $0x50] sm:$0xff] }
  0x18   : > { %1014 = vmatprep.mubr.msk.f32.mxu1 %vm307_vm1, %v198_v20  ;;  %1042 = vmatprep.mubr.msk.f32.mxu0 %vm307_vm1, %v946_v21  ;;  %v948_v23 = vld [vmem:[%s1168_s10 + $0x60] sm:$0xff]  ;;  %v930_v28 = vld [vmem:[%s1168_s10 + $0x70] sm:$0xff] }
  0x19   : > { %v949_v24 = vld [vmem:[%s1168_s10 + $0x80] sm:$0xff] }
  0x1a   : > { %v959_v29 = vld [vmem:[%s1168_s10 + $0x81] sm:$0xff] }
  0x1b   : > { %1015 = vmatmul.mubr.msk.f32.vlgmr.msra.gmra.mrb[0].mxu1 %vm307_vm1, %v946_v21  ;;  %1043 = vmatmul.mubr.msk.f32.vlgmr.msra.gmra.mrb[0].mxu0 %vm307_vm1, %v947_v22 }
  0x1c   : > { %1063 = vmatpush3.bf16.msra.mxu1 %v1060_v16  ;;  %1049 = vmatpush3.msra.mxu0 %v960_v17 }
  0x1d   : > { %1017 = vmatprep.mubr.msk.f32.mxu1 %vm307_vm1, %v947_v22  ;;  %1045 = vmatprep.mubr.msk.f32.mxu0 %vm307_vm1, %v948_v23 }
  0x1f   : > { %1018 = vmatmul.mubr.msk.f32.gmra.mrb[2].mxu1 %vm307_vm1, %v948_v23  ;;  %1046 = vmatmul.mubr.msk.f32.gmra.mrb[2].mxu0 %vm307_vm1, %v949_v24 }
  0x20   : > { %1024 = vmatprep.mubr.msk.f32.mxu1 %vm307_vm1, %v927_v25  ;;  %1050 = vmatprep.mubr.msk.f32.mxu0 %vm209_vm0, %v205_v12 }
  0x23   : > { %1025 = vmatmul.mubr.msk.f32.vlgmr.msra.gmra.mrb[0].mxu1 %vm307_vm1, %v928_v26  ;;  %1051 = vmatmul.mubr.msk.f32.vlgmr.msra.gmra.mrb[0].mxu0 %vm209_vm0, %v206_v14 }
  0x24   : > { %1027 = vmatprep.mubr.msk.f32.mxu1 %vm307_vm1, %v929_v27  ;;  %1053 = vmatprep.mubr.msk.f32.mxu0 %vm209_vm0, %v207_v18 }
  0x27   : > { %1028 = vmatmul.mubr.msk.f32.gmra.mrb[2].mxu1 %vm307_vm1, %v930_v28  ;;  %1054 = vmatmul.mubr.msk.f32.gmra.mrb[2].mxu0 %vm209_vm0, %v959_v29 }
  0xf6   : > { %v1026_v30 = vpop.f32.mrb[0].mxu1  ;;  %v1052_v31 = vpop.f32.mrb[0].mxu0 }
  0xf7   : > { %v1068_v33 = vadd.f32 %v1052_v31, %v1026_v30  ;;  %v491_v34 = vpop.f32.mrb[1].mxu1  ;;  %v814_v35 = vpop.f32.mrb[1].mxu0 }
  0xf8   : > { %v1069_v36 = vadd.f32 %v814_v35, %v491_v34 }
  0xf9   : > { %v845_v37 = vadd.f32 %v1068_v33, %v965_v32 }
  0xfa   : > { %v844_v38 = vadd.f32 %v1069_v36, %v965_v32  ;;  %v1029_v39 = vpop.f32.mrb[2].mxu1  ;;  %v1055_v40 = vpop.f32.mrb[2].mxu0 }
  0xfb   : > { %v849_v41 = vmax.f32 %v845_v37, 0.0  ;;  %v1070_v42 = vadd.f32 %v1055_v40, %v1029_v39  ;;  %v501_v43 = vpop.f32.mrb[3].mxu1  ;;  %v824_v44 = vpop.f32.mrb[3].mxu0 }
  0xfc   : > { %v848_v45 = vmax.f32 %v844_v38, 0.0  ;;  %v1071_v46 = vadd.f32 %v824_v44, %v501_v43 }
  0xfd   : > { %853 = vst.msk [vmem:[%s197_s20 + $0x8] sm:$0xff] %vm307_vm1, %v849_v41  ;;  %v847_v47 = vadd.f32 %v1070_v42, %v965_v32 }
  0xfe   : > { %852 = vst.msk [vmem:[%s197_s20] sm:$0xff] %vm307_vm1, %v848_v45  ;;  %v846_v48 = vadd.f32 %v1071_v46, %v965_v32 }
  0xff   : > { %v851_v49 = vmax.f32 %v847_v47, 0.0 }
 0x100   : > { %v850_v50 = vmax.f32 %v846_v48, 0.0 }
 0x101   : > { %855 = vst.msk [vmem:[%s197_s20 + $0x18] sm:$0xff] %vm307_vm1, %v851_v49 }
 0x102   : > { %854 = vst.msk [vmem:[%s197_s20 + $0x10] sm:$0xff] %vm307_vm1, %v850_v50 }
 0x103 PF: > { %s14_s15 = sadd.s32 1, %s1103_s15  }
 0x104   : > { %p11_p4 = scmp.ge.s32.totalorder %s14_s15, 4  }
 0x106   :  { %13 = sbr.rel (!%p11_p4) target bundleno = 1 (0x1), region = 72 }

// kernel: deeplab_v1_forward.6
= control target key start
LH: loop header
LB: loop body
LE: loop exit
PB: predicated region body
PF: predicated region fallthrough
CT: control target
= control target key end

     0   :  { %s1014_s15 = smov 0   ;;  %s1118_s0 = inlined_call_operand.vmem [shape: f32[2,3,2,9,32], index: 0, kind: input, shape index: {}]   ;;  %s1119_s1 = inlined_call_operand.vmem [shape: f32[3,32,16], index: 1, kind: input, shape index: {}]   ;;  %s1120_s2 = inlined_call_operand.vmem [shape: f32[3,16,16], index: 2, kind: input, shape index: {}]   ;;  %s1121_s3 = inlined_call_operand.vmem [shape: f32[1,16], index: 3, kind: input, shape index: {}]   ;;  %s1122_s4 = inlined_call_operand.vmem [shape: f32[2,2,8,16], index: 4, kind: output, shape index: {}]  }
   0x1 LB: > { %s798_s16 = sadd.s32 4294967295, %s987_s15   ;;  %p802_p0 = scmp.ge.s32.totalorder %s987_s15, 1  ;;  %s987_s15 = sphi %s1014_s15, %s14_s15  }
   0x2   : > { %p162_p1 = scmp.lt.s32.totalorder %s987_s15, 3 }
   0x4   : > { %p163_p2 = pnand %p802_p0, %p162_p1 }
   0x5   : > { %v200_v0 = vld [vmem:[%s1119_s1] sm:$0xff] (!%p163_p2)  ;;  %v201_v1 = vld [vmem:[%s1119_s1 + $0x8] sm:$0xff] (!%p163_p2)  ;;  %p188_p3 = scmp.lt.s32.totalorder (!%p163_p2), %s798_s16, 1  ;;  %v202_v5 = vld [vmem:[%s1119_s1 + $0x10] sm:$0xff] (!%p163_p2)  ;;  %vm208_vm0 = vcmask (!%p163_p2), 130048   ;;  %vm290_vm1 = vcmask (!%p163_p2), 261120  }
   0x6   : > { %166 = sbr.rel (%p163_p2) target bundleno = 259 (0x103), region = 36  ;;  %v206_v2 = vld [vmem:[%s1120_s2] sm:$0xff] (!%p163_p2)  ;;  %v930_v3 = vpack.c.bf16 (!%p163_p2), %v201_v1, %v200_v0  ;;  %v207_v4 = vld [vmem:[%s1120_s2 + $0x8] sm:$0xff] (!%p163_p2)  ;;  %v203_v6 = vld [vmem:[%s1119_s1 + $0x18] sm:$0xff] (!%p163_p2) }
   0x7   : > { %v926_v7 = vpack.c.bf16 (!%p163_p2), %v207_v4, %v206_v2  ;;  %v934_v8 = vpack.c.bf16 (!%p163_p2), %v203_v6, %v202_v5  ;;  %v820_v9 = vld [vmem:[%s1120_s2 + $0x10] sm:$0xff] (!%p163_p2)  ;;  %v821_v10 = vld [vmem:[%s1120_s2 + $0x18] sm:$0xff] (!%p163_p2)  ;;  %v812_v12 = vld [vmem:[%s1119_s1 + $0x20] sm:$0xff] (!%p163_p2) }
   0x8   : > { %931 = vmatprep.subr.bf16.mxu1 (!%p163_p2), %v930_v3  ;;  %v946_v11 = vpack.c.bf16 (!%p163_p2), %v821_v10, %v820_v9  ;;  %v813_v13 = vld [vmem:[%s1119_s1 + $0x28] sm:$0xff] (!%p163_p2)  ;;  %v826_v14 = vld [vmem:[%s1119_s1 + $0x40] sm:$0xff] (!%p163_p2)  ;;  %v814_v17 = vld [vmem:[%s1119_s1 + $0x30] sm:$0xff] (!%p163_p2) }
   0x9   : > { %927 = vmatprep.subr.bf16.mxu0 (!%p163_p2), %v926_v7  ;;  %933 = vmatpush3.bf16.msra.mxu1 (!%p163_p2), %v930_v3  ;;  %v827_v15 = vld [vmem:[%s1119_s1 + $0x48] sm:$0xff] (!%p163_p2)  ;;  %v938_v16 = vpack.c.bf16 (!%p163_p2), %v813_v13, %v812_v12  ;;  %v815_v18 = vld [vmem:[%s1119_s1 + $0x38] sm:$0xff] (!%p163_p2)  ;;  %v828_v19 = vld [vmem:[%s1119_s1 + $0x50] sm:$0xff] (!%p163_p2) }
   0xa   : > { %929 = vmatpush3.bf16.msra.mxu0 (!%p163_p2), %v926_v7  ;;  %935 = vmatprep.subr.bf16.mxu1 (!%p163_p2), %v934_v8  ;;  %v950_v25 = vpack.c.bf16 (!%p163_p2), %v827_v15, %v826_v14  ;;  %v829_v26 = vld [vmem:[%s1119_s1 + $0x58] sm:$0xff] (!%p163_p2)  ;;  %v942_v27 = vpack.c.bf16 (!%p163_p2), %v815_v18, %v814_v17  ;;  %v834_v31 = vld [vmem:[%s1120_s2 + $0x20] sm:$0xff] (!%p163_p2)  ;;  %v835_v32 = vld [vmem:[%s1120_s2 + $0x28] sm:$0xff] (!%p163_p2) }
   0xb   : > { %947 = vmatprep.subr.bf16.mxu0 (!%p163_p2), %v946_v11  ;;  %v954_v29 = vpack.c.bf16 (!%p163_p2), %v829_v26, %v828_v19  ;;  %v958_v33 = vpack.c.bf16 (!%p163_p2), %v835_v32, %v834_v31  ;;  %v838_v44 = vld [vmem:[%s1121_s3] ss:$0 sm:$0xff] (!%p163_p2) }
   0xd   : > { %s1124_s16 = smov (!%p188_p3, %s798_s16), 1  ;;  %937 = vmatpush3.bf16.msra.mxu1 %v934_v8 }
   0xe   : > { %s972_s11 = smul.u32 96, %s1124_s16  ;;  %939 = vmatprep.subr.bf16.mxu1 %v938_v16  ;;  %s841_s9 = sshll.u32 %s1124_s16, 4 }
   0xf   : > { %s197_s12 = scalar_lea.vmem %s1122_s4, %s841_s9 }
  0x10   : > { %s1064_s20 = scalar_lea.vmem %s1118_s0, %s972_s11 }
  0x11   : > { %v204_v20 = vld [vmem:[%s1064_s20 + $0x1] sm:$0xff]  ;;  %v818_v24 = vld [vmem:[%s1064_s20 + $0x11] sm:$0xff] }
  0x12   : > { %v205_v21 = vld [vmem:[%s1064_s20 + $0x21] sm:$0xff]  ;;  %876 = vmatprep.mubr.msk.f32.mxu0 %vm208_vm0, %v204_v20  ;;  %v819_v28 = vld [vmem:[%s1064_s20 + $0x31] sm:$0xff] }
  0x13   : > { %v198_v22 = vld [vmem:[%s1064_s20] sm:$0xff]  ;;  %877 = vmatmul.mubr.msk.f32.vlgmr.msra.gmra.mrb[0].mxu0 %vm208_vm0, %v205_v21  ;;  %v810_v30 = vld [vmem:[%s1064_s20 + $0x10] sm:$0xff] }
  0x14   : > { %v199_v23 = vld [vmem:[%s1064_s20 + $0x20] sm:$0xff]  ;;  %887 = vmatprep.mubr.msk.f32.mxu1 %vm290_vm1, %v198_v22  ;;  %949 = vmatpush3.bf16.msra.mxu0 %v946_v11  ;;  %v811_v34 = vld [vmem:[%s1064_s20 + $0x30] sm:$0xff] }
  0x15   : > { %888 = vmatmul.mubr.msk.f32.vlgmr.msra.gmra.mrb[0].mxu1 %vm290_vm1, %v199_v23  ;;  %905 = vmatprep.mubr.msk.f32.mxu0 %vm208_vm0, %v818_v24  ;;  %v825_v35 = vld [vmem:[%s1064_s20 + $0x40] sm:$0xff] }
  0x16   : > { %941 = vmatpush3.bf16.msra.mxu1 %v938_v16  ;;  %951 = vmatprep.subr.bf16.mxu0 %v950_v25  ;;  %v833_v36 = vld [vmem:[%s1064_s20 + $0x41] sm:$0xff] }
  0x17   : > { %906 = vmatmul.mubr.msk.f32.vlgmr.msra.gmra.mrb[2].mxu0 %vm208_vm0, %v819_v28  ;;  %943 = vmatprep.subr.bf16.mxu1 %v942_v27 }
  0x18   : > { %953 = vmatpush3.bf16.msra.mxu0 %v950_v25  ;;  %898 = vmatprep.mubr.msk.f32.mxu1 %vm290_vm1, %v810_v30 }
  0x19   : > { %955 = vmatprep.subr.bf16.mxu0 %v954_v29  ;;  %916 = vmatprep.mubr.msk.f32.mxu0 %vm290_vm1, %v199_v23 }
  0x1a   : > { %945 = vmatpush3.bf16.msra.mxu1 %v942_v27 }
  0x1c   : > { %957 = vmatpush3.bf16.msra.mxu0 %v954_v29 }
  0x1d   : > { %899 = vmatmul.mubr.msk.f32.vlgmr.msra.gmra.mrb[0].mxu1 %vm290_vm1, %v811_v34  ;;  %959 = vmatprep.subr.bf16.mxu0 %v958_v33 }
  0x1f   : > { %917 = vmatmul.mubr.msk.f32.vlgmr.msra.gmra.mrb[2].mxu0 %vm290_vm1, %v825_v35 }
  0x20   : > { %961 = vmatpush3.bf16.msra.mxu0 %v958_v33  ;;  %923 = vmatprep.mubr.msk.f32.mxu0 %vm208_vm0, %v205_v21 }
  0x27   : > { %924 = vmatmul.mubr.msk.f32.vlgmr.msra.gmra.mrb[2].mxu0 %vm208_vm0, %v833_v36 }
  0xe6   : > { %v878_v37 = vpop.f32.mrb[0].mxu0 }
  0xe7   : > { %v281_v38 = vpop.f32.mrb[1].mxu0 }
  0xf0   : > { %v900_v39 = vpop.f32.mrb[0].mxu1 }
  0xf1   : > { %v962_v40 = vadd.f32 %v900_v39, %v878_v37  ;;  %v452_v41 = vpop.f32.mrb[1].mxu1 }
  0xf2   : > { %v964_v42 = vadd.f32 %v452_v41, %v281_v38 }
  0xfa   : > { %v925_v43 = vpop.f32.mrb[2].mxu0 }
  0xfb   : > { %v963_v45 = vadd.f32 %v962_v40, %v925_v43  ;;  %v719_v46 = vpop.f32.mrb[3].mxu0 }
  0xfc   : > { %v965_v47 = vadd.f32 %v964_v42, %v719_v46 }
  0xfd   : > { %v738_v48 = vadd.f32 %v963_v45, %v838_v44 }
  0xfe   : > { %v737_v49 = vadd.f32 %v965_v47, %v838_v44 }
  0xff   : > { %v740_v50 = vmax.f32 %v738_v48, 0.0 }
 0x100   : > { %v739_v51 = vmax.f32 %v737_v49, 0.0 }
 0x101   : > { %742 = vst.msk [vmem:[%s197_s12 + $0x8] sm:$0xff] %vm208_vm0, %v740_v50 }
 0x102   : > { %741 = vst.msk [vmem:[%s197_s12] sm:$0xff] %vm208_vm0, %v739_v51 }
 0x103 PF: > { %s14_s15 = sadd.s32 1, %s987_s15  }
 0x104   : > { %p11_p4 = scmp.ge.s32.totalorder %s14_s15, 4  }
 0x106   :  { %13 = sbr.rel (!%p11_p4) target bundleno = 1 (0x1), region = 72 }

// kernel: deeplab_v1_forward.4
= control target key start
LH: loop header
LB: loop body
LE: loop exit
PB: predicated region body
PF: predicated region fallthrough
CT: control target
= control target key end

     0   :  { %s1481_s15 = smov 0   ;;  %s1639_s0 = inlined_call_operand.vmem [shape: f32[2,9,2,9,8], index: 0, kind: input, shape index: {}]   ;;  %s1640_s1 = inlined_call_operand.vmem [shape: f32[3,8,8], index: 1, kind: input, shape index: {}]   ;;  %s1641_s2 = inlined_call_operand.vmem [shape: f32[3,4,8], index: 2, kind: input, shape index: {}]   ;;  %s1642_s3 = inlined_call_operand.vmem [shape: f32[1,8], index: 3, kind: input, shape index: {}]   ;;  %s1643_s4 = inlined_call_operand.vmem [shape: f32[2,8,8,8], index: 4, kind: output, shape index: {}]  }
   0x1 LB: > { %s1162_s16 = sadd.s32 4294967295, %s1454_s15   ;;  %p1166_p0 = scmp.ge.s32.totalorder %s1454_s15, 1  ;;  %s1454_s15 = sphi %s1481_s15, %s14_s15  }
   0x2   : > { %p162_p1 = scmp.lt.s32.totalorder %s1454_s15, 3 }
   0x4   : > { %p163_p2 = pnand %p1166_p0, %p162_p1 }
   0x5   : > { %v215_v0 = vld [vmem:[%s1641_s2] sm:$0xf] (!%p163_p2)  ;;  %vm241_vm0 = vcmask (!%p163_p2), 1043456   ;;  %v1212_v1 = vld [vmem:[%s1641_s2 + $0x4] sm:$0xf] (!%p163_p2)  ;;  %p188_p3 = scmp.lt.s32.totalorder (!%p163_p2), %s1162_s16, 1 }
   0x6   : > { %166 = sbr.rel (%p163_p2) target bundleno = 283 (0x11b), region = 36  ;;  %1315 = vmatprep.subr.msk.mxu1 (!%p163_p2), %vm241_vm0, %v215_v0  ;;  %1357 = vmatprep.subr.msk.mxu0 (!%p163_p2), %vm241_vm0, %v1212_v1  ;;  %v206_v2 = vld [vmem:[%s1640_s1] sm:$0xff] (!%p163_p2)  ;;  %v1230_v3 = vld [vmem:[%s1640_s1 + $0x10] sm:$0xff] (!%p163_p2)  ;;  %vm216_vm1 = vcmask (!%p163_p2), 31744   ;;  %v1195_v10 = vld [vmem:[%s1640_s1 + $0x8] sm:$0xff] (!%p163_p2)  ;;  %vm350_vm2 = vcmask (!%p163_p2), 64512  }
   0x7   : > { %1316 = vmatpush3.msk.msra.mxu1 (!%p163_p2), %vm241_vm0, %v215_v0  ;;  %1358 = vmatpush3.msk.msra.mxu0 (!%p163_p2), %vm241_vm0, %v1212_v1  ;;  %v1247_v11 = vld [vmem:[%s1641_s2 + $0x8] sm:$0xf] (!%p163_p2)  ;;  %v1257_v42 = vld [vmem:[%s1642_s3] ss:$0 sm:$0xff] (!%p163_p2) }
   0x8   : > { %1329 = vmatprep.subr.mxu1 (!%p163_p2), %v206_v2  ;;  %1371 = vmatprep.subr.mxu0 (!%p163_p2), %v1230_v3 }
   0xd   : > { %s1645_s16 = smov (!%p188_p3, %s1162_s16), 1 }
   0xe   : > { %s1439_s25 = smul.u32 288, %s1645_s16  ;;  %s1260_s9 = sshll.u32 %s1645_s16, 6 }
   0xf   : > { %s1618_s12 = scalar_lea.vmem %s1643_s4, %s1260_s9 }
  0x10   : > { %s1511_s28 = scalar_lea.vmem %s1639_s0, %s1439_s25 }
  0x11   : > { %v207_v4 = vld [vmem:[%s1511_s28 + $0x1] sm:$0xff]  ;;  %v1204_v5 = vld [vmem:[%s1511_s28 + $0x11] sm:$0xff] }
  0x12   : > { %v1516_v6 = vld [vmem:[%s1511_s28 + $0x21] sm:$0xff]  ;;  %1317 = vmatprep.mubr.msk.f32.mxu1 %vm216_vm1, %v207_v4  ;;  %1359 = vmatprep.mubr.msk.f32.mxu0 %vm216_vm1, %v1204_v5  ;;  %v1205_v7 = vld [vmem:[%s1511_s28 + $0x31] sm:$0xff] }
  0x13   : > { %v1522_v8 = vld [vmem:[%s1511_s28 + $0x41] sm:$0xff]  ;;  %v1206_v9 = vld [vmem:[%s1511_s28 + $0x51] sm:$0xff]  ;;  %1318 = vmatmul.mubr.msk.f32.vlgmr.msra.gmra.mrb[0].mxu1 %vm216_vm1, %v1516_v6  ;;  %1360 = vmatmul.mubr.msk.f32.vlgmr.msra.gmra.mrb[0].mxu0 %vm216_vm1, %v1205_v7 }
  0x14   : > { %1330 = vmatpush3.msra.mxu1 %v206_v2  ;;  %1372 = vmatpush3.msra.mxu0 %v1230_v3  ;;  %v210_v12 = vld [vmem:[%s1511_s28 + $0x61] sm:$0xff]  ;;  %v1207_v13 = vld [vmem:[%s1511_s28 + $0x71] sm:$0xff] }
  0x15   : > { %1320 = vmatprep.mubr.msk.f32.mxu1 %vm216_vm1, %v1522_v8  ;;  %1362 = vmatprep.mubr.msk.f32.mxu0 %vm216_vm1, %v1206_v9  ;;  %v211_v14 = vld [vmem:[%s1511_s28 + $0x81] sm:$0xff]  ;;  %v1208_v15 = vld [vmem:[%s1511_s28 + $0x91] sm:$0xff] }
  0x16   : > { %1343 = vmatprep.subr.mxu1 %v1195_v10  ;;  %1385 = vmatprep.subr.msk.mxu0 %vm241_vm0, %v1247_v11  ;;  %v212_v16 = vld [vmem:[%s1511_s28 + $0xa1] sm:$0xff]  ;;  %v1209_v17 = vld [vmem:[%s1511_s28 + $0xb1] sm:$0xff] }
  0x17   : > { %1321 = vmatmul.mubr.msk.f32.gmra.mrb[2].mxu1 %vm216_vm1, %v210_v12  ;;  %1363 = vmatmul.mubr.msk.f32.gmra.mrb[2].mxu0 %vm216_vm1, %v1207_v13  ;;  %v213_v18 = vld [vmem:[%s1511_s28 + $0xc1] sm:$0xff]  ;;  %v1210_v19 = vld [vmem:[%s1511_s28 + $0xd1] sm:$0xff] }
  0x18   : > { %1323 = vmatprep.mubr.msk.f32.mxu1 %vm216_vm1, %v211_v14  ;;  %1365 = vmatprep.mubr.msk.f32.mxu0 %vm216_vm1, %v1208_v15  ;;  %v214_v20 = vld [vmem:[%s1511_s28 + $0xe1] sm:$0xff]  ;;  %v1211_v21 = vld [vmem:[%s1511_s28 + $0xf1] sm:$0xff] }
  0x19   : > { %v198_v22 = vld [vmem:[%s1511_s28] sm:$0xff]  ;;  %v1187_v31 = vld [vmem:[%s1511_s28 + $0x10] sm:$0xff] }
  0x1a   : > { %v1222_v23 = vld [vmem:[%s1511_s28 + $0x20] sm:$0xff]  ;;  %v1188_v32 = vld [vmem:[%s1511_s28 + $0x30] sm:$0xff] }
  0x1b   : > { %1324 = vmatmul.mubr.msk.f32.gmra.mrb[4].mxu1 %vm216_vm1, %v212_v16  ;;  %1366 = vmatmul.mubr.msk.f32.gmra.mrb[4].mxu0 %vm216_vm1, %v1209_v17  ;;  %v1223_v24 = vld [vmem:[%s1511_s28 + $0x40] sm:$0xff]  ;;  %v1189_v33 = vld [vmem:[%s1511_s28 + $0x50] sm:$0xff] }
  0x1c   : > { %1326 = vmatprep.mubr.msk.f32.mxu1 %vm216_vm1, %v213_v18  ;;  %1368 = vmatprep.mubr.msk.f32.mxu0 %vm216_vm1, %v1210_v19  ;;  %v1224_v25 = vld [vmem:[%s1511_s28 + $0x60] sm:$0xff]  ;;  %v1190_v34 = vld [vmem:[%s1511_s28 + $0x70] sm:$0xff] }
  0x1d   : > { %v1225_v26 = vld [vmem:[%s1511_s28 + $0x80] sm:$0xff]  ;;  %v1191_v35 = vld [vmem:[%s1511_s28 + $0x90] sm:$0xff] }
  0x1e   : > { %v1226_v27 = vld [vmem:[%s1511_s28 + $0xa0] sm:$0xff]  ;;  %v1192_v36 = vld [vmem:[%s1511_s28 + $0xb0] sm:$0xff] }
  0x1f   : > { %1327 = vmatmul.mubr.msk.f32.gmra.mrb[6].mxu1 %vm216_vm1, %v214_v20  ;;  %1369 = vmatmul.mubr.msk.f32.gmra.mrb[6].mxu0 %vm216_vm1, %v1211_v21  ;;  %v1227_v28 = vld [vmem:[%s1511_s28 + $0xc0] sm:$0xff]  ;;  %v1193_v37 = vld [vmem:[%s1511_s28 + $0xd0] sm:$0xff] }
  0x20   : > { %1331 = vmatprep.mubr.msk.f32.mxu1 %vm350_vm2, %v198_v22  ;;  %1373 = vmatprep.mubr.msk.f32.mxu0 %vm350_vm2, %v1222_v23  ;;  %v1228_v29 = vld [vmem:[%s1511_s28 + $0xe0] sm:$0xff]  ;;  %v1194_v38 = vld [vmem:[%s1511_s28 + $0xf0] sm:$0xff] }
  0x21   : > { %v1229_v30 = vld [vmem:[%s1511_s28 + $0x100] sm:$0xff] }
  0x22   : > { %v1246_v39 = vld [vmem:[%s1511_s28 + $0x101] sm:$0xff] }
  0x23   : > { %1332 = vmatmul.mubr.msk.f32.vlgmr.msra.gmra.mrb[0].mxu1 %vm350_vm2, %v1222_v23  ;;  %1374 = vmatmul.mubr.msk.f32.vlgmr.msra.gmra.mrb[0].mxu0 %vm350_vm2, %v1223_v24 }
  0x24   : > { %1344 = vmatpush3.msra.mxu1 %v1195_v10  ;;  %1386 = vmatpush3.msk.msra.mxu0 %vm241_vm0, %v1247_v11 }
  0x25   : > { %1334 = vmatprep.mubr.msk.f32.mxu1 %vm350_vm2, %v1223_v24  ;;  %1376 = vmatprep.mubr.msk.f32.mxu0 %vm350_vm2, %v1224_v25 }
  0x27   : > { %1335 = vmatmul.mubr.msk.f32.gmra.mrb[2].mxu1 %vm350_vm2, %v1224_v25  ;;  %1377 = vmatmul.mubr.msk.f32.gmra.mrb[2].mxu0 %vm350_vm2, %v1225_v26 }
  0x28   : > { %1337 = vmatprep.mubr.msk.f32.mxu1 %vm350_vm2, %v1225_v26  ;;  %1379 = vmatprep.mubr.msk.f32.mxu0 %vm350_vm2, %v1226_v27 }
  0x2b   : > { %1338 = vmatmul.mubr.msk.f32.gmra.mrb[4].mxu1 %vm350_vm2, %v1226_v27  ;;  %1380 = vmatmul.mubr.msk.f32.gmra.mrb[4].mxu0 %vm350_vm2, %v1227_v28 }
  0x2c   : > { %1340 = vmatprep.mubr.msk.f32.mxu1 %vm350_vm2, %v1227_v28  ;;  %1382 = vmatprep.mubr.msk.f32.mxu0 %vm350_vm2, %v1228_v29 }
  0x2f   : > { %1341 = vmatmul.mubr.msk.f32.gmra.mrb[6].mxu1 %vm350_vm2, %v1228_v29  ;;  %1383 = vmatmul.mubr.msk.f32.gmra.mrb[6].mxu0 %vm350_vm2, %v1229_v30 }
  0x30   : > { %1345 = vmatprep.mubr.msk.f32.mxu1 %vm350_vm2, %v1187_v31  ;;  %1387 = vmatprep.mubr.msk.f32.mxu0 %vm216_vm1, %v1516_v6 }
  0x33   : > { %1346 = vmatmul.mubr.msk.f32.vlgmr.msra.gmra.mrb[0].mxu1 %vm350_vm2, %v1188_v32  ;;  %1388 = vmatmul.mubr.msk.f32.vlgmr.msra.gmra.mrb[0].mxu0 %vm216_vm1, %v1522_v8 }
  0x34   : > { %1348 = vmatprep.mubr.msk.f32.mxu1 %vm350_vm2, %v1189_v33  ;;  %1390 = vmatprep.mubr.msk.f32.mxu0 %vm216_vm1, %v210_v12 }
  0x37   : > { %1349 = vmatmul.mubr.msk.f32.gmra.mrb[2].mxu1 %vm350_vm2, %v1190_v34  ;;  %1391 = vmatmul.mubr.msk.f32.gmra.mrb[2].mxu0 %vm216_vm1, %v211_v14 }
  0x38   : > { %1351 = vmatprep.mubr.msk.f32.mxu1 %vm350_vm2, %v1191_v35  ;;  %1393 = vmatprep.mubr.msk.f32.mxu0 %vm216_vm1, %v212_v16 }
  0x3b   : > { %1352 = vmatmul.mubr.msk.f32.gmra.mrb[4].mxu1 %vm350_vm2, %v1192_v36  ;;  %1394 = vmatmul.mubr.msk.f32.gmra.mrb[4].mxu0 %vm216_vm1, %v213_v18 }
  0x3c   : > { %1354 = vmatprep.mubr.msk.f32.mxu1 %vm350_vm2, %v1193_v37  ;;  %1396 = vmatprep.mubr.msk.f32.mxu0 %vm216_vm1, %v214_v20 }
  0x3f   : > { %1355 = vmatmul.mubr.msk.f32.gmra.mrb[6].mxu1 %vm350_vm2, %v1194_v38  ;;  %1397 = vmatmul.mubr.msk.f32.gmra.mrb[6].mxu0 %vm216_vm1, %v1246_v39 }
 0x106   : > { %v1347_v40 = vpop.f32.mrb[0].mxu1  ;;  %v1389_v41 = vpop.f32.mrb[0].mxu0 }
 0x107   : > { %v1399_v43 = vadd.f32 %v1389_v41, %v1347_v40  ;;  %v581_v44 = vpop.f32.mrb[1].mxu1  ;;  %v1029_v45 = vpop.f32.mrb[1].mxu0 }
 0x108   : > { %v1400_v46 = vadd.f32 %v1029_v45, %v581_v44 }
 0x109   : > { %v1084_v47 = vadd.f32 %v1399_v43, %v1257_v42 }
 0x10a   : > { %v1083_v48 = vadd.f32 %v1400_v46, %v1257_v42  ;;  %v1350_v49 = vpop.f32.mrb[2].mxu1  ;;  %v1392_v50 = vpop.f32.mrb[2].mxu0 }
 0x10b   : > { %v1092_v51 = vmax.f32 %v1084_v47, 0.0  ;;  %v1401_v52 = vadd.f32 %v1392_v50, %v1350_v49  ;;  %v591_v53 = vpop.f32.mrb[3].mxu1  ;;  %v1039_v54 = vpop.f32.mrb[3].mxu0 }
 0x10c   : > { %v1091_v55 = vmax.f32 %v1083_v48, 0.0  ;;  %v1402_v56 = vadd.f32 %v1039_v54, %v591_v53 }
 0x10d   : > { %1100 = vst.msk [vmem:[%s1618_s12 + $0x8] sm:$0xff] %vm350_vm2, %v1092_v51  ;;  %v1086_v57 = vadd.f32 %v1401_v52, %v1257_v42 }
 0x10e   : > { %1099 = vst.msk [vmem:[%s1618_s12] sm:$0xff] %vm350_vm2, %v1091_v55  ;;  %v1085_v58 = vadd.f32 %v1402_v56, %v1257_v42  ;;  %v1353_v59 = vpop.f32.mrb[4].mxu1  ;;  %v1395_v60 = vpop.f32.mrb[4].mxu0 }
 0x10f   : > { %v1094_v61 = vmax.f32 %v1086_v57, 0.0  ;;  %v1403_v62 = vadd.f32 %v1395_v60, %v1353_v59  ;;  %v601_v63 = vpop.f32.mrb[5].mxu1  ;;  %v1049_v0 = vpop.f32.mrb[5].mxu0 }
 0x110   : > { %v1093_v1 = vmax.f32 %v1085_v58, 0.0  ;;  %v1404_v2 = vadd.f32 %v1049_v0, %v601_v63 }
 0x111   : > { %1102 = vst.msk [vmem:[%s1618_s12 + $0x18] sm:$0xff] %vm350_vm2, %v1094_v61  ;;  %v1088_v3 = vadd.f32 %v1403_v62, %v1257_v42 }
 0x112   : > { %1101 = vst.msk [vmem:[%s1618_s12 + $0x10] sm:$0xff] %vm350_vm2, %v1093_v1  ;;  %v1087_v4 = vadd.f32 %v1404_v2, %v1257_v42  ;;  %v1356_v5 = vpop.f32.mrb[6].mxu1  ;;  %v1398_v6 = vpop.f32.mrb[6].mxu0 }
 0x113   : > { %v1096_v7 = vmax.f32 %v1088_v3, 0.0  ;;  %v1405_v8 = vadd.f32 %v1398_v6, %v1356_v5  ;;  %v611_v9 = vpop.f32.mrb[7].mxu1  ;;  %v1059_v10 = vpop.f32.mrb[7].mxu0 }
 0x114   : > { %v1095_v11 = vmax.f32 %v1087_v4, 0.0  ;;  %v1406_v12 = vadd.f32 %v1059_v10, %v611_v9 }
 0x115   : > { %1104 = vst.msk [vmem:[%s1618_s12 + $0x28] sm:$0xff] %vm350_vm2, %v1096_v7  ;;  %v1090_v13 = vadd.f32 %v1405_v8, %v1257_v42 }
 0x116   : > { %1103 = vst.msk [vmem:[%s1618_s12 + $0x20] sm:$0xff] %vm350_vm2, %v1095_v11  ;;  %v1089_v14 = vadd.f32 %v1406_v12, %v1257_v42 }
 0x117   : > { %v1098_v15 = vmax.f32 %v1090_v13, 0.0 }
 0x118   : > { %v1097_v16 = vmax.f32 %v1089_v14, 0.0 }
 0x119   : > { %1106 = vst.msk [vmem:[%s1618_s12 + $0x38] sm:$0xff] %vm350_vm2, %v1098_v15 }
 0x11a   : > { %1105 = vst.msk [vmem:[%s1618_s12 + $0x30] sm:$0xff] %vm350_vm2, %v1097_v16 }
 0x11b PF: > { %s14_s15 = sadd.s32 1, %s1454_s15  }
 0x11c   : > { %p11_p4 = scmp.ge.s32.totalorder %s14_s15, 4  }
 0x11e   :  { %13 = sbr.rel (!%p11_p4) target bundleno = 1 (0x1), region = 72 }

// kernel: deeplab_v1_forward.7
= control target key start
LH: loop header
LB: loop body
LE: loop exit
PB: predicated region body
PF: predicated region fallthrough
CT: control target
= control target key end

     0   :  { %9 = vsyncpa [#allocation3], 0  ;;  %s1677_s0 = inlined_call_operand.vmem [shape: f32[2,2,2,17], index: 0, kind: input, shape index: {}]   ;;  %s1678_s1 = inlined_call_operand.vmem [shape: f32[5,17], index: 1, kind: input, shape index: {}]   ;;  %s1679_s2 = inlined_call_operand.vmem [shape: f32[16,2], index: 2, kind: input, shape index: {}]   ;;  %s1680_s3 = inlined_call_operand.vmem [shape: f32[2,16], index: 3, kind: input, shape index: {}]   ;;  %s1681_s4 = inlined_call_operand.hbm [shape: f32[2,5,16,16], index: 4, kind: output, shape index: {}]  }
   0x1   :  { %11 = vsyncpa [#allocation3 + $0x1], 0  ;;  %s1485_s15 = smov 0   ;;  %s1487_s16 = smov 0  }
   0x2   :  { %s1489_s17 = smov 0   ;;  %s1491_s18 = smov 0  }
   0x3 LB: > { %s1506_s19 = sadd.s32 4294967295, %s1455_s18   ;;  %s1217_s20 = sadd.s32 4294967294, %s1455_s18   ;;  %s1455_s18 = sphi %s1491_s18, %s1687_s18   ;;  %s1451_s17 = sphi %s1489_s17, %s1686_s17   ;;  %s1447_s16 = sphi %s1487_s16, %s1685_s16   ;;  %s1443_s15 = sphi %s1485_s15, %s1684_s15  }
   0x4   : > { %s1510_s21 = sadd.s32 1, %s1455_s18   ;;  %s113_s22 = sadd.s32 1, %s1451_s17 }
   0x5   : > { %s110_s23 = ssub.s32 %s1455_s18, %s1510_s21  ;;  %p123_p0 = scmp.ne.s32.totalorder %s1451_s17, %s1447_s16 }
   0x6   : > { %p111_p1 = scmp.eq.s32.totalorder %s110_s23, 0  ;;  %p124_p2 = scmp.eq.s32.totalorder %s1506_s19, 1 }
   0x7   : > { %p129_p3 = scmp.ne.s32.totalorder %s1447_s16, %s1443_s15  ;;  %p130_p4 = scmp.eq.s32.totalorder %s1217_s20, 1 }
   0x8   : > { %s1521_s24 = scalar_select %p111_p1, %s1451_s17, %s113_s22  }
   0x9   : > { %p1523_p5 = por %p124_p2, %p123_p0  ;;  %p1527_p6 = por %p130_p4, %p129_p3 }
   0xa   : > { %p1220_p7 = scmp.ge.s32.totalorder %s1455_s18, 1  ;;  %p165_p8 = scmp.lt.s32.totalorder %s1455_s18, 3 }
   0xc   : > { %p166_p9 = pnand %p1220_p7, %p165_p8 }
   0xd   : > { %p191_p10 = scmp.lt.s32.totalorder (!%p166_p9), %s1506_s19, 1  ;;  %v1230_v0 = vld [vmem:[%s1678_s1 + $0x1] ss:$0 sm:$0xff] (!%p166_p9)  ;;  %v1223_v1 = vld [vmem:[%s1678_s1] ss:$0 sm:$0xff] (!%p166_p9)  ;;  %vm208_vm0 = vcmask (!%p166_p9), 132096   ;;  %v217_v28 = vlaneseq (!%p166_p9) }
   0xe   : > { %169 = sbr.rel (%p166_p9) target bundleno = 638 (0x27e), region = 36  ;;  %v1239_v8 = vld [vmem:[%s1678_s1 + $0x2] ss:$0 sm:$0xff] (!%p166_p9)  ;;  %v1248_v15 = vld [vmem:[%s1678_s1 + $0x3] ss:$0 sm:$0xff] (!%p166_p9)  ;;  %vm229_vm1 = vcmask (!%p166_p9), 15360  }
   0xf   : > { %v1257_v20 = vld [vmem:[%s1678_s1 + $0x4] ss:$0 sm:$0xff] (!%p166_p9)  ;;  %v218_v29 = vand.u32 (!%p166_p9), 127, %v217_v28  ;;  %v220_v30 = vshrl.u32 (!%p166_p9), %v217_v28, 7  ;;  %vm227_vm2 = vcmask (!%p166_p9), 1041409   ;;  %vm236_vm3 = vcmask (!%p166_p9), 1041408  }
  0x10   : > { %v198_v27 = vld [vmem:[%s1679_s2] sm:$0xff] (!%p166_p9)  ;;  %v199_v41 = vld [vmem:[%s1679_s2 + $0x8] sm:$0xff] (!%p166_p9)  ;;  %s188_s5 = sand.u32 (!%p166_p9), 1, %s1447_s16   ;;  %vm398_vm4 = vcmask (!%p166_p9), 130048   ;;  %s1351_s8 = smul.u32 (!%p166_p9), 1280, %s1506_s19 }
  0x11   : > { %1302 = vmatprep.mubr.msk.f32.mxu0 (!%p166_p9), %vm229_vm1, %v198_v27  ;;  %v221_v33 = vsub.s32 (!%p166_p9), %v218_v29, %v220_v30  ;;  %v200_v58 = vld [vmem:[%s1680_s3] sm:$0x3] (!%p166_p9)  ;;  %s1350_s6 = smul.u32 (!%p166_p9), 80, %s188_s5  ;;  %s1457_s14 = smov (!%p166_p9), [#allocation2]  }
  0x12   : > { %1305 = vmatprep.subr.msk.mxu1 (!%p166_p9), %vm236_vm3, %v200_v58  ;;  %s1630_s12 = scalar_lea.hbm (!%p166_p9), %s1681_s4, %s1351_s8  ;;  %s1397_s20 = sshll.u32 (!%p166_p9), %s1457_s14, 4  ;;  %s1398_s20 = int_to_ptr.vmem [resolvable:$false] %s1397_s20 }
  0x13   : > { %1306 = vmatpush3.msk.msra.mxu1 (!%p166_p9), %vm236_vm3, %v200_v58  ;;  %s190_s7 = scalar_lea.vmem (!%p166_p9), [#allocation2], %s1350_s6  ;;  %s1399_s22 = scalar_lea.vmem (!%p166_p9), %s1398_s20, 2560 }
  0x14   : > { %1315 = vmatprep.subr.msk.mxu1 (!%p166_p9), %vm236_vm3, %v200_v58 }
  0x15   : > { %s192_s27 = scalar_select %p191_p10, %s1506_s19, 1 }
  0x16   : > { %s1636_s19 = scalar_lea.sflag [#allocation3], %s188_s5 }
  0x17   : > { %s1269_s28 = sshll.u32 %s192_s27, 2 }
  0x18   : > { %s195_s9 = scalar_lea.vmem %s1677_s0, %s1269_s28 }
  0x19   : > { %v196_v2 = vld [vmem:[%s195_s9] sm:$0x3]  ;;  %v197_v3 = vld [vmem:[%s195_s9 + $0x2] sm:$0x3]  ;;  %s1155_s9 = sshll.u32 %s190_s7, 4  ;;  %s1632_s9 = int_to_ptr.vmem [resolvable:$true] %s1155_s9 }
  0x1a   : > { %v406_v4 = vmul.f32 %v1230_v0, %v196_v2  ;;  %v206_v5 = vmul.f32 %v1223_v1, %v196_v2  ;;  %v407_v6 = vmul.f32 %v1230_v0, %v197_v3  ;;  %v207_v7 = vmul.f32 %v1223_v1, %v197_v3  ;;  %s1393_s13 = scalar_lea.vmem %s1632_s9, 1280  ;;  %p1400_p0 = scmp.lt.s32.totalorder %s1632_s9, %s1398_s20 }
  0x1b   : > { %v592_v13 = vmul.f32 %v1239_v8, %v197_v3  ;;  %v591_v14 = vmul.f32 %v1239_v8, %v196_v2  ;;  %v777_v18 = vmul.f32 %v1248_v15, %v197_v3  ;;  %v776_v19 = vmul.f32 %v1248_v15, %v196_v2  ;;  %p1394_p11 = scmp.ne.s32.totalorder %s1632_s9, %s1393_s13  ;;  %p1401_p1 = scmp.lt.s32.totalorder %s1399_s22, %s1393_s13 }
  0x1c   : > { %v408_v9 = vsel %vm208_vm0, %v406_v4, 0.0  ;;  %v209_v10 = vsel %vm208_vm0, %v206_v5, 0.0  ;;  %v411_v11 = vsel %vm208_vm0, %v407_v6, 0.0  ;;  %v212_v12 = vsel %vm208_vm0, %v207_v7, 0.0 }
  0x1d   : > { %409 = vadd.xlane.f32.xlu1 %v408_v9  ;;  %210 = vadd.xlane.f32.xlu0 %v209_v10  ;;  %v596_v16 = vsel %vm208_vm0, %v592_v13, 0.0  ;;  %v593_v17 = vsel %vm208_vm0, %v591_v14, 0.0  ;;  %v781_v21 = vsel %vm208_vm0, %v777_v18, 0.0  ;;  %v778_v22 = vsel %vm208_vm0, %v776_v19, 0.0  ;;  %p1395_p12 = pnand %p1394_p11, %p1523_p5  ;;  %p1402_p2 = por %p1401_p1, %p1400_p0 }
  0x1e   : > { %v962_v23 = vmul.f32 %v1257_v20, %v197_v3  ;;  %v961_v24 = vmul.f32 %v1257_v20, %v196_v2 }
  0x1f   : > { %p1396_p13 = pneg %p1395_p12 }
  0x20   : > { %v966_v25 = vsel %vm208_vm0, %v962_v23, 0.0  ;;  %v963_v26 = vsel %vm208_vm0, %v961_v24, 0.0 }
  0x21   : > { %412 = vadd.xlane.f32.xlu1 %v411_v11  ;;  %213 = vadd.xlane.f32.xlu0 %v212_v12  ;;  %p1403_p3 = pnand %p1402_p2, %p1396_p13 }
  0x25   : > { %597 = vadd.xlane.f32.xlu1 %v596_v16  ;;  %594 = vadd.xlane.f32.xlu0 %v593_v17 }
  0x29   : > { %782 = vadd.xlane.f32.xlu1 %v781_v21  ;;  %779 = vadd.xlane.f32.xlu0 %v778_v22 }
  0x2d   : > { %967 = vadd.xlane.f32.xlu1 %v966_v25  ;;  %964 = vadd.xlane.f32.xlu0 %v963_v26 }
  0xaa   : > { %v410_v31 = vpop.xlane.xlu1 %409  ;;  %v211_v32 = vpop.xlane.xlu0 %210 }
  0xab   : > { %v419_v36 = vrot.slane %v410_v31, %v221_v33  ;;  %v222_v37 = vrot.slane %v211_v32, %v221_v33 }
  0xae   : > { %v413_v34 = vpop.xlane.xlu1 %412  ;;  %v214_v35 = vpop.xlane.xlu0 %213 }
  0xaf   : > { %v423_v38 = vrot.slane %v413_v34, %v221_v33  ;;  %v226_v39 = vrot.slane %v214_v35, %v221_v33 }
  0xb1   : > { %v228_v40 = vsel %vm227_vm2, %v226_v39, %v222_v37  ;;  %v424_v46 = vsel %vm227_vm2, %v423_v38, %v419_v36 }
  0xb2   : > { %1300 = vmatprep.subr.msk.mxu0 %vm236_vm3, %v228_v40  ;;  %v598_v42 = vpop.xlane.xlu1 %597  ;;  %v595_v43 = vpop.xlane.xlu0 %594 }
  0xb3   : > { %v608_v44 = vrot.slane %v598_v42, %v221_v33  ;;  %1301 = vmatpush3.msk.msra.mxu0 %vm236_vm3, %v228_v40  ;;  %v604_v45 = vrot.slane %v595_v43, %v221_v33 }
  0xb4   : > { %1303 = vmatmul.mubr.msk.f32.vlgmr.msra.gmra.mrb[0].mxu0 %vm229_vm1, %v199_v41  ;;  %1310 = vmatprep.subr.msk.mxu0 %vm236_vm3, %v424_v46 }
  0xb5   : > { %1311 = vmatpush3.msk.msra.mxu0 %vm236_vm3, %v424_v46  ;;  %1312 = vmatprep.mubr.msk.f32.mxu0 %vm229_vm1, %v198_v27  ;;  %v609_v47 = vsel %vm227_vm2, %v608_v44, %v604_v45 }
  0xb6   : > { %v783_v48 = vpop.xlane.xlu1 %782  ;;  %1320 = vmatprep.subr.msk.mxu0 %vm236_vm3, %v609_v47  ;;  %v780_v49 = vpop.xlane.xlu0 %779 }
  0xb7   : > { %v793_v50 = vrot.slane %v783_v48, %v221_v33  ;;  %v789_v51 = vrot.slane %v780_v49, %v221_v33 }
  0xb8   : > { %1313 = vmatmul.mubr.msk.f32.vlgmr.msra.gmra.mrb[2].mxu0 %vm229_vm1, %v199_v41 }
  0xb9   : > { %1321 = vmatpush3.msk.msra.mxu0 %vm236_vm3, %v609_v47  ;;  %1322 = vmatprep.mubr.msk.f32.mxu0 %vm229_vm1, %v198_v27  ;;  %v794_v52 = vsel %vm227_vm2, %v793_v50, %v789_v51 }
  0xba   : > { %v968_v53 = vpop.xlane.xlu1 %967  ;;  %1330 = vmatprep.subr.msk.mxu0 %vm236_vm3, %v794_v52  ;;  %v965_v54 = vpop.xlane.xlu0 %964 }
  0xbb   : > { %v978_v55 = vrot.slane %v968_v53, %v221_v33  ;;  %v974_v56 = vrot.slane %v965_v54, %v221_v33 }
  0xbc   : > { %1323 = vmatmul.mubr.msk.f32.vlgmr.msra.gmra.mrb[4].mxu0 %vm229_vm1, %v199_v41 }
  0xbd   : > { %1331 = vmatpush3.msk.msra.mxu0 %vm236_vm3, %v794_v52  ;;  %1332 = vmatprep.mubr.msk.f32.mxu0 %vm229_vm1, %v198_v27  ;;  %v979_v57 = vsel %vm227_vm2, %v978_v55, %v974_v56 }
  0xbe   : > { %1340 = vmatprep.subr.msk.mxu0 %vm236_vm3, %v979_v57 }
  0xc0   : > { %1333 = vmatmul.mubr.msk.f32.vlgmr.msra.gmra.mrb[6].mxu0 %vm229_vm1, %v199_v41 }
  0xc1   : > { %1341 = vmatpush3.msk.msra.mxu0 %vm236_vm3, %v979_v57  ;;  %1342 = vmatprep.mubr.msk.f32.mxu0 %vm229_vm1, %v198_v27 }
  0xc4   : > { %1343 = vmatmul.mubr.msk.f32.vlgmr.msra.gmra.mrb[8].mxu0 %vm229_vm1, %v199_v41 }
 0x187   : > { %v1304_v59 = vpop.f32.mrb[0].mxu0 }
 0x188   : > { %v305_v60 = vpop.f32.mrb[1].mxu0 }
 0x189   : > { %1307 = vmatprep.mubr.msk.f32.mxu1 %vm229_vm1, %v305_v60 }
 0x18a   : > { %1308 = vmatmul.mubr.msk.f32.vlgmr.msra.gmra.mrb[0].mxu1 %vm229_vm1, %v1304_v59 }
 0x18b   : > { %v1314_v61 = vpop.f32.mrb[2].mxu0  ;;  %1316 = vmatpush3.msk.msra.mxu1 %vm236_vm3, %v200_v58 }
 0x18c   : > { %v493_v62 = vpop.f32.mrb[3].mxu0  ;;  %1325 = vmatprep.subr.msk.mxu1 %vm236_vm3, %v200_v58 }
 0x18d   : > { %1317 = vmatprep.mubr.msk.f32.mxu1 %vm229_vm1, %v493_v62 }
 0x18e   : > { %1318 = vmatmul.mubr.msk.f32.vlgmr.msra.gmra.mrb[2].mxu1 %vm229_vm1, %v1314_v61 }
 0x18f   : > { %v1324_v63 = vpop.f32.mrb[4].mxu0  ;;  %1326 = vmatpush3.msk.msra.mxu1 %vm236_vm3, %v200_v58 }
 0x190   : > { %v678_v0 = vpop.f32.mrb[5].mxu0  ;;  %1335 = vmatprep.subr.msk.mxu1 %vm236_vm3, %v200_v58 }
 0x191   : > { %1327 = vmatprep.mubr.msk.f32.mxu1 %vm229_vm1, %v678_v0 }
 0x192   : > { %1328 = vmatmul.mubr.msk.f32.vlgmr.msra.gmra.mrb[4].mxu1 %vm229_vm1, %v1324_v63 }
 0x193   : > { %v1334_v1 = vpop.f32.mrb[6].mxu0  ;;  %1336 = vmatpush3.msk.msra.mxu1 %vm236_vm3, %v200_v58 }
 0x194   : > { %v863_v2 = vpop.f32.mrb[7].mxu0  ;;  %1345 = vmatprep.subr.msk.mxu1 %vm236_vm3, %v200_v58 }
 0x195   : > { %1337 = vmatprep.mubr.msk.f32.mxu1 %vm229_vm1, %v863_v2 }
 0x196   : > { %1338 = vmatmul.mubr.msk.f32.vlgmr.msra.gmra.mrb[6].mxu1 %vm229_vm1, %v1334_v1 }
 0x197   : > { %v1344_v3 = vpop.f32.mrb[8].mxu0  ;;  %1346 = vmatpush3.msk.msra.mxu1 %vm236_vm3, %v200_v58 }
 0x198   : > { %v1048_v4 = vpop.f32.mrb[9].mxu0 }
 0x199   : > { %1347 = vmatprep.mubr.msk.f32.mxu1 %vm229_vm1, %v1048_v4 }
 0x19a   : > { %1348 = vmatmul.mubr.msk.f32.vlgmr.msra.gmra.mrb[8].mxu1 %vm229_vm1, %v1344_v3 }
 0x25d   : > { %v1309_v5 = vpop.f32.mrb[0].mxu1 }
 0x25e   : > { %400 = vst.msk [vmem:[%s190_s7 + $0x8] sm:$0xff] %vm398_vm4, %v1309_v5  ;;  %v389_v6 = vpop.f32.mrb[1].mxu1 }
 0x25f   : > { %399 = vst.msk [vmem:[%s190_s7] sm:$0xff] %vm398_vm4, %v389_v6 }
 0x261   : > { %v1319_v7 = vpop.f32.mrb[2].mxu1 }
 0x262   : > { %1238 = vst.msk [vmem:[%s190_s7 + $0x18] sm:$0xff] %vm398_vm4, %v1319_v7  ;;  %v574_v8 = vpop.f32.mrb[3].mxu1 }
 0x263   : > { %1237 = vst.msk [vmem:[%s190_s7 + $0x10] sm:$0xff] %vm398_vm4, %v574_v8 }
 0x265   : > { %v1329_v9 = vpop.f32.mrb[4].mxu1 }
 0x266   : > { %1247 = vst.msk [vmem:[%s190_s7 + $0x28] sm:$0xff] %vm398_vm4, %v1329_v9  ;;  %v759_v10 = vpop.f32.mrb[5].mxu1 }
 0x267   : > { %1246 = vst.msk [vmem:[%s190_s7 + $0x20] sm:$0xff] %vm398_vm4, %v759_v10 }
 0x269   : > { %v1339_v11 = vpop.f32.mrb[6].mxu1 }
 0x26a   : > { %1256 = vst.msk [vmem:[%s190_s7 + $0x38] sm:$0xff] %vm398_vm4, %v1339_v11  ;;  %v944_v12 = vpop.f32.mrb[7].mxu1 }
 0x26b   : > { %1255 = vst.msk [vmem:[%s190_s7 + $0x30] sm:$0xff] %vm398_vm4, %v944_v12 }
 0x26d   : > { %v1349_v13 = vpop.f32.mrb[8].mxu1 }
 0x26e   : > { %1265 = vst.msk [vmem:[%s190_s7 + $0x48] sm:$0xff] %vm398_vm4, %v1349_v13  ;;  %v1129_v14 = vpop.f32.mrb[9].mxu1 }
 0x26f   : > { %1264 = vst.msk [vmem:[%s190_s7 + $0x40] sm:$0xff] %vm398_vm4, %v1129_v14 }
 0x270   : > { %1406 = shalt.err (!%p1403_p3)
}
 0x271   : > { %s1407_s23 = scalar_lea.hbm %s1630_s12, 1280  ;;  %s1411_s29 = scalar_lea.hbm %s1681_s4, 2560 }
 0x272   : > { %p1408_p4 = scmp.ne.s32.totalorder %s1630_s12, %s1407_s23  ;;  %p1412_p9 = scmp.lt.u32.totalorder %s1630_s12, %s1681_s4 }
 0x273   : > { %p1413_p10 = scmp.lt.u32.totalorder %s1411_s29, %s1407_s23  ;;  %p1415_p12 = scmp.lt.u32.totalorder %s1407_s23, %s1630_s12 }
 0x274   : > { %p1409_p7 = pnand %p1408_p4, %p1523_p5 }
 0x275   : > { %p1414_p11 = por %p1413_p10, %p1412_p9 }
 0x276   : > { %p1410_p8 = pneg %p1409_p7 }
 0x277   : > { %p1416_p13 = por %p1415_p12, %p1414_p11 }
 0x279   : > { %p1417_p0 = pnand %p1416_p13, %p1410_p8 }
 0x27b   : > { %1420 = shalt.err (!%p1417_p0)
}
 0x27c   : > { %s1458_s6 = smov 128   ;;  %s1459_s7 = smov 8  }
 0x27d   : > { %1352 = dma.vmem_to_hbm [thread:$0]  (%p1523_p5), %s1632_s9, 1280, %s1630_s12, %s1636_s19, %s1458_s6, %s1458_s6, %s1459_s7  }
 0x27e PF: > { %p1358_p1 = scmp.ge.s32.totalorder %s1455_s18, 2  ;;  %s1170_s8 = sand.u32 1, %s1443_s15  }
 0x27f   : > { %s1171_s10 = scalar_lea.sflag [#allocation3], %s1170_s8 }
 0x280   : > { %p1355_p2 = pnand %p1358_p1, %p1527_p6 }
 0x282   : > { %1438 = dma.done.wait (!%p1355_p2), %s1171_s10, 1280  }
 0x283   : > { %1440 = vsyncadd (!%p1355_p2), %s1171_s10, 4294966016  ;;  %p14_p3 = scmp.ge.s32.totalorder %s1510_s21, 4   ;;  %s1684_s15 = smov %s1447_s16 }
 0x284   : > { %s1685_s16 = smov %s1451_s17  ;;  %s1686_s17 = smov %s1521_s24 }
 0x285   : > { %s1687_s18 = smov %s1510_s21  ;;  %16 = sbr.rel (!%p14_p3) target bundleno = 3 (0x3), region = 75 }
 0x28c   :  { %1176 = vsyncpa [#allocation3], 1 }
 0x28d   :  { %1178 = vsyncpa [#allocation3 + $0x1], 1 }

</bundles_post_ra>
